<compile_context>
chip_gen: v5e
topology: v5e:2x2
jax: 0.10.0
libtpu: 0.0.40
codegen_flags: <defaults>
</compile_context>

<pallas_src>
import functools

import jax
import jax.numpy as jnp
from jax.experimental import pallas as pl
from jax.experimental.pallas import tpu as pltpu

E = 64                       # embedding_size
N_OUT = 19110 * 2            # 38220 output features of the final Linear
TN = 2048                    # lane tile for the big output layer
N_PAD = ((N_OUT + TN - 1) // TN) * TN   # 38912 -> 19 grid steps


def _fused_mlp_kernel(x_ref, wi_ref, bi_ref, w1_ref, b1_ref,
                      w2_ref, b2_ref, wo_ref, bo_ref, o_ref):
    # Hidden chain (tiny) recomputed per grid step -> steps are independent.
    h = jnp.tanh(jnp.dot(x_ref[...], wi_ref[...],
                         preferred_element_type=jnp.float32) + bi_ref[...])
    h = jnp.tanh(jnp.dot(h, w1_ref[...],
                         preferred_element_type=jnp.float32) + b1_ref[...])
    h = jnp.tanh(jnp.dot(h, w2_ref[...],
                         preferred_element_type=jnp.float32) + b2_ref[...])
    # Final (no tanh) layer: lane-dense (B, TN) tile of the 38220-wide output.
    o_ref[...] = (jnp.dot(h, wo_ref[...],
                          preferred_element_type=jnp.float32)
                  + bo_ref[...]).astype(o_ref.dtype)


def nn_forward(x, params):
    wi, bi, w1, b1, w2, b2, wo, bo = params
    B = x.shape[0]
    n_pad = wo.shape[1]
    assert n_pad % TN == 0

    const = lambda shape: pl.BlockSpec(shape, lambda j: (0, 0))

    out_pad = pl.pallas_call(
        _fused_mlp_kernel,
        out_shape=jax.ShapeDtypeStruct((B, n_pad), x.dtype),
        grid_spec=pltpu.PrefetchScalarGridSpec(
            num_scalar_prefetch=0,
            grid=(n_pad // TN,),
            in_specs=[
                const((B, E)),                               # x        (resident)
                const((E, E)), const((1, E)),                # initial  (resident)
                const((E, 2 * E)), const((1, 2 * E)),        # lin1     (resident)
                const((2 * E, 4 * E)), const((1, 4 * E)),    # lin2     (resident)
                pl.BlockSpec((4 * E, TN), lambda j: (0, j)),  # W_out tile stream
                pl.BlockSpec((1, TN), lambda j: (0, j)),      # b_out tile stream
            ],
            out_specs=pl.BlockSpec((B, TN), lambda j: (0, j)),
        ),
        compiler_params=pltpu.CompilerParams(
            dimension_semantics=("parallel",)),
    )(x, wi, bi, w1, b1, w2, b2, wo, bo)

    return out_pad[:, :N_OUT]


def nn_forward_ref(x, params):
    """Pure-JAX reference (highest precision) for correctness checking."""
    wi, bi, w1, b1, w2, b2, wo, bo = params
    dot = functools.partial(jnp.dot, precision=jax.lax.Precision.HIGHEST)
    h = jnp.tanh(dot(x, wi) + bi)
    h = jnp.tanh(dot(h, w1) + b1)
    h = jnp.tanh(dot(h, w2) + b2)
    return (dot(h, wo) + bo)[:, :N_OUT]


def init_params(key):
    def linear(k, fan_in, fan_out):
        kw, kb = jax.random.split(k)
        bound = 1.0 / fan_in ** 0.5          # PyTorch-style uniform init
        w = jax.random.uniform(kw, (fan_in, fan_out), jnp.float32, -bound, bound)
        b = jax.random.uniform(kb, (1, fan_out), jnp.float32, -bound, bound)
        return w, b

    k0, k1, k2, k3 = jax.random.split(key, 4)
    wi, bi = linear(k0, E, E)                # initial: 64 -> 64
    w1, b1 = linear(k1, E, 2 * E)            # lin1:    64 -> 128
    w2, b2 = linear(k2, 2 * E, 4 * E)        # lin2:    128 -> 256
    wo, bo = linear(k3, 4 * E, N_OUT)        # out:     256 -> 38220

    # Zero-pad the big output layer ONCE at init to a multiple of TN so the
    # kernel only sees lane-aligned tiles (no per-call pad / ragged blocks).
    pad = N_PAD - N_OUT
    wo = jnp.pad(wo, ((0, 0), (0, pad)))
    bo = jnp.pad(bo, ((0, 0), (0, pad)))
    return (wi, bi, w1, b1, w2, b2, wo, bo)


if __name__ == "__main__":
    key = jax.random.PRNGKey(0)
    kp, kx = jax.random.split(key)
    params = init_params(kp)

    # Input implied by the module: (batch, embedding_size=64). Batch of 8
    # keeps the sublane dimension aligned.
    x = jax.random.normal(kx, (8, E), dtype=jnp.float32)

    out = jax.jit(nn_forward)(x, params)
    jax.block_until_ready(out)

    assert out.shape == (8, N_OUT), out.shape
    assert bool(jnp.all(jnp.isfinite(out)))

    ref = nn_forward_ref(x, params)
    assert bool(jnp.allclose(out, ref, atol=1e-2, rtol=1e-2)), (
        float(jnp.max(jnp.abs(out - ref))))

    print("KERNEL_OK")
</pallas_src>

<mosaic_0001>
module attributes {stable_mosaic.version = 11 : i64} {
  func.func @_fused_mlp_kernel(%arg0: i32, %arg1: memref<8x64xf32, #tpu.memory_space<vmem>>, %arg2: memref<64x64xf32, #tpu.memory_space<vmem>>, %arg3: memref<1x64xf32, #tpu.memory_space<vmem>>, %arg4: memref<64x128xf32, #tpu.memory_space<vmem>>, %arg5: memref<1x128xf32, #tpu.memory_space<vmem>>, %arg6: memref<128x256xf32, #tpu.memory_space<vmem>>, %arg7: memref<1x256xf32, #tpu.memory_space<vmem>>, %arg8: memref<256x2048xf32, #tpu.memory_space<vmem>>, %arg9: memref<1x2048xf32, #tpu.memory_space<vmem>>, %arg10: memref<8x2048xf32, #tpu.memory_space<vmem>>) attributes {dimension_semantics = [#tpu.dimension_semantics<parallel>], iteration_bounds = array<i64: 19>, scalar_prefetch = 0 : i64, scratch_operands = 0 : i64, tpu.core_type = #tpu.core_type<tc>, window_params = [{pipeline_mode = #tpu.pipeline_mode<synchronous>, transform_indices = @transform_0, window_bounds = array<i64: 8, 64>}, {pipeline_mode = #tpu.pipeline_mode<synchronous>, transform_indices = @transform_1, window_bounds = array<i64: 64, 64>}, {pipeline_mode = #tpu.pipeline_mode<synchronous>, transform_indices = @transform_2, window_bounds = array<i64: 1, 64>}, {pipeline_mode = #tpu.pipeline_mode<synchronous>, transform_indices = @transform_3, window_bounds = array<i64: 64, 128>}, {pipeline_mode = #tpu.pipeline_mode<synchronous>, transform_indices = @transform_4, window_bounds = array<i64: 1, 128>}, {pipeline_mode = #tpu.pipeline_mode<synchronous>, transform_indices = @transform_5, window_bounds = array<i64: 128, 256>}, {pipeline_mode = #tpu.pipeline_mode<synchronous>, transform_indices = @transform_6, window_bounds = array<i64: 1, 256>}, {transform_indices = @transform_7, window_bounds = array<i64: 256, 2048>}, {transform_indices = @transform_8, window_bounds = array<i64: 1, 2048>}, {transform_indices = @transform_9, window_bounds = array<i64: 8, 2048>}]} {
    %c0 = arith.constant 0 : index
    %c0_0 = arith.constant 0 : index
    %0 = vector.load %arg1[%c0, %c0_0] : memref<8x64xf32, #tpu.memory_space<vmem>>, vector<8x64xf32>
    %c0_1 = arith.constant 0 : index
    %c0_2 = arith.constant 0 : index
    %1 = vector.load %arg2[%c0_1, %c0_2] : memref<64x64xf32, #tpu.memory_space<vmem>>, vector<64x64xf32>
    %cst = arith.constant dense<0.000000e+00> : vector<8x64xf32>
    %2 = tpu.matmul %0, %1, %cst {dimension_numbers = #tpu.dot_dimension_numbers<[1], [0], [0], [1], [0, 0, 1, 1], [], []>} : vector<8x64xf32>, vector<64x64xf32>, vector<8x64xf32> -> vector<8x64xf32>
    %c0_3 = arith.constant 0 : index
    %c0_4 = arith.constant 0 : index
    %3 = vector.load %arg3[%c0_3, %c0_4] : memref<1x64xf32, #tpu.memory_space<vmem>>, vector<1x64xf32>
    %4 = vector.broadcast %3 : vector<1x64xf32> to vector<8x64xf32>
    %5 = arith.addf %2, %4 : vector<8x64xf32>
    %6 = math.tanh %5 : vector<8x64xf32>
    %c0_5 = arith.constant 0 : index
    %c0_6 = arith.constant 0 : index
    %7 = vector.load %arg4[%c0_5, %c0_6] : memref<64x128xf32, #tpu.memory_space<vmem>>, vector<64x128xf32>
    %cst_7 = arith.constant dense<0.000000e+00> : vector<8x128xf32>
    %8 = tpu.matmul %6, %7, %cst_7 {dimension_numbers = #tpu.dot_dimension_numbers<[1], [0], [0], [1], [0, 0, 1, 1], [], []>} : vector<8x64xf32>, vector<64x128xf32>, vector<8x128xf32> -> vector<8x128xf32>
    %c0_8 = arith.constant 0 : index
    %c0_9 = arith.constant 0 : index
    %9 = vector.load %arg5[%c0_8, %c0_9] : memref<1x128xf32, #tpu.memory_space<vmem>>, vector<1x128xf32>
    %10 = vector.broadcast %9 : vector<1x128xf32> to vector<8x128xf32>
    %11 = arith.addf %8, %10 : vector<8x128xf32>
    %12 = math.tanh %11 : vector<8x128xf32>
    %c0_10 = arith.constant 0 : index
    %c0_11 = arith.constant 0 : index
    %13 = vector.load %arg6[%c0_10, %c0_11] : memref<128x256xf32, #tpu.memory_space<vmem>>, vector<128x256xf32>
    %cst_12 = arith.constant dense<0.000000e+00> : vector<8x256xf32>
    %14 = tpu.matmul %12, %13, %cst_12 {dimension_numbers = #tpu.dot_dimension_numbers<[1], [0], [0], [1], [0, 0, 1, 1], [], []>} : vector<8x128xf32>, vector<128x256xf32>, vector<8x256xf32> -> vector<8x256xf32>
    %c0_13 = arith.constant 0 : index
    %c0_14 = arith.constant 0 : index
    %15 = vector.load %arg7[%c0_13, %c0_14] : memref<1x256xf32, #tpu.memory_space<vmem>>, vector<1x256xf32>
    %16 = vector.broadcast %15 : vector<1x256xf32> to vector<8x256xf32>
    %17 = arith.addf %14, %16 : vector<8x256xf32>
    %18 = math.tanh %17 : vector<8x256xf32>
    %c0_15 = arith.constant 0 : index
    %c0_16 = arith.constant 0 : index
    %19 = vector.load %arg8[%c0_15, %c0_16] : memref<256x2048xf32, #tpu.memory_space<vmem>>, vector<256x2048xf32>
    %cst_17 = arith.constant dense<0.000000e+00> : vector<8x2048xf32>
    %20 = tpu.matmul %18, %19, %cst_17 {dimension_numbers = #tpu.dot_dimension_numbers<[1], [0], [0], [1], [0, 0, 1, 1], [], []>} : vector<8x256xf32>, vector<256x2048xf32>, vector<8x2048xf32> -> vector<8x2048xf32>
    %c0_18 = arith.constant 0 : index
    %c0_19 = arith.constant 0 : index
    %21 = vector.load %arg9[%c0_18, %c0_19] : memref<1x2048xf32, #tpu.memory_space<vmem>>, vector<1x2048xf32>
    %22 = vector.broadcast %21 : vector<1x2048xf32> to vector<8x2048xf32>
    %23 = arith.addf %20, %22 : vector<8x2048xf32>
    %c0_20 = arith.constant 0 : index
    %c0_21 = arith.constant 0 : index
    %24 = vector.load %arg10[%c0_20, %c0_21] : memref<8x2048xf32, #tpu.memory_space<vmem>>, vector<8x2048xf32>
    tpu.vector_store %arg10[%c0_20, %c0_21], %23 {strides = array<i32>} : memref<8x2048xf32, #tpu.memory_space<vmem>>, vector<8x2048xf32>,
    return
  }
  func.func @transform_0(%arg0: i32) -> (i32, i32) {
    %c0_i32 = arith.constant 0 : i32
    %c0_i32_0 = arith.constant 0 : i32
    %c0_i32_1 = arith.constant 0 : i32
    return %c0_i32, %c0_i32_0 : i32, i32
  }
  func.func @transform_1(%arg0: i32) -> (i32, i32) {
    %c0_i32 = arith.constant 0 : i32
    %c0_i32_0 = arith.constant 0 : i32
    %c0_i32_1 = arith.constant 0 : i32
    return %c0_i32, %c0_i32_0 : i32, i32
  }
  func.func @transform_2(%arg0: i32) -> (i32, i32) {
    %c0_i32 = arith.constant 0 : i32
    %c0_i32_0 = arith.constant 0 : i32
    %c0_i32_1 = arith.constant 0 : i32
    return %c0_i32, %c0_i32_0 : i32, i32
  }
  func.func @transform_3(%arg0: i32) -> (i32, i32) {
    %c0_i32 = arith.constant 0 : i32
    %c0_i32_0 = arith.constant 0 : i32
    %c0_i32_1 = arith.constant 0 : i32
    return %c0_i32, %c0_i32_0 : i32, i32
  }
  func.func @transform_4(%arg0: i32) -> (i32, i32) {
    %c0_i32 = arith.constant 0 : i32
    %c0_i32_0 = arith.constant 0 : i32
    %c0_i32_1 = arith.constant 0 : i32
    return %c0_i32, %c0_i32_0 : i32, i32
  }
  func.func @transform_5(%arg0: i32) -> (i32, i32) {
    %c0_i32 = arith.constant 0 : i32
    %c0_i32_0 = arith.constant 0 : i32
    %c0_i32_1 = arith.constant 0 : i32
    return %c0_i32, %c0_i32_0 : i32, i32
  }
  func.func @transform_6(%arg0: i32) -> (i32, i32) {
    %c0_i32 = arith.constant 0 : i32
    %c0_i32_0 = arith.constant 0 : i32
    %c0_i32_1 = arith.constant 0 : i32
    return %c0_i32, %c0_i32_0 : i32, i32
  }
  func.func @transform_7(%arg0: i32) -> (i32, i32) {
    %c0_i32 = arith.constant 0 : i32
    %c0_i32_0 = arith.constant 0 : i32
    return %c0_i32, %arg0 : i32, i32
  }
  func.func @transform_8(%arg0: i32) -> (i32, i32) {
    %c0_i32 = arith.constant 0 : i32
    %c0_i32_0 = arith.constant 0 : i32
    return %c0_i32, %arg0 : i32, i32
  }
  func.func @transform_9(%arg0: i32) -> (i32, i32) {
    %c0_i32 = arith.constant 0 : i32
    %c0_i32_0 = arith.constant 0 : i32
    return %c0_i32, %arg0 : i32, i32
  }
}

</mosaic_0001>

<bundles_post_ra>
// kernel: nn_forward.1
= control target key start
LH: loop header
LB: loop body
LE: loop exit
PB: predicated region body
PF: predicated region fallthrough
CT: control target
= control target key end

     0   :  { %s3361_s0 = inlined_call_operand.hbm [shape: f32[8,64], index: 0, kind: input, shape index: {}]   ;;  %s3362_s1 = inlined_call_operand.hbm [shape: f32[64,64], index: 1, kind: input, shape index: {}]   ;;  %s3363_s2 = inlined_call_operand.hbm [shape: f32[1,64], index: 2, kind: input, shape index: {}]   ;;  %s3364_s3 = inlined_call_operand.hbm [shape: f32[64,128], index: 3, kind: input, shape index: {}]   ;;  %s3365_s4 = inlined_call_operand.hbm [shape: f32[1,128], index: 4, kind: input, shape index: {}]   ;;  %s3366_s5 = inlined_call_operand.hbm [shape: f32[128,256], index: 5, kind: input, shape index: {}]   ;;  %s3367_s6 = inlined_call_operand.hbm [shape: f32[1,256], index: 6, kind: input, shape index: {}]   ;;  %s3368_s7 = inlined_call_operand.hbm [shape: f32[256,38912], index: 7, kind: input, shape index: {}]   ;;  %s3369_s8 = inlined_call_operand.hbm [shape: f32[1,38912], index: 8, kind: input, shape index: {}]   ;;  %s3370_s9 = inlined_call_operand.vmem [shape: f32[8,38912], index: 9, kind: output, shape index: {}]  }
   0x1   :  { %3373 = sst [smem:[#allocation22_spill]] %s3361_s0 }
   0x2   :  { %3374 = sst [smem:[#allocation23_spill]] %s3362_s1 }
   0x3   :  { %3375 = sst [smem:[#allocation24_spill]] %s3364_s3 }
   0x4   :  { %3376 = sst [smem:[#allocation25_spill]] %s3366_s5 }
   0x5   :  { %14 = vsyncpa [#allocation3], 0 }
   0x6   :  { %15 = vsyncpa [#allocation5], 0 }
   0x7   :  { %16 = vsyncpa [#allocation8], 0 }
   0x8   :  { %17 = vsyncpa [#allocation11], 0 }
   0x9   :  { %18 = vsyncpa [#allocation14], 0 }
   0xa   :  { %20 = vsyncpa [#allocation14 + $0x1], 0  ;;  %s2565_s30 = smov 0   ;;  %s2567_s10 = smov 0  }
   0xb   :  { %s2569_s11 = smov 0   ;;  %s2571_s12 = smov 0  }
   0xc LB: > { %s3377_s1 = sld [smem:[#allocation23_spill]]  ;;  %s2589_s16 = sadd.s32 4294967295, %s2500_s12   ;;  %s2500_s12 = sphi %s2571_s12, %s3394_s12   ;;  %s2496_s11 = sphi %s2569_s11, %s3393_s11   ;;  %s2492_s10 = sphi %s2567_s10, %s3392_s10   ;;  %s2488_s30 = sphi %s2565_s30, %s3391_s30  }
   0xd   : > { %p2018_p0 = scmp.ge.s32.totalorder %s2500_s12, 1  ;;  %p194_p1 = scmp.eq.s32.totalorder %s2589_s16, 0 }
   0xe   : > { %p256_p2 = scmp.lt.s32.totalorder %s2500_s12, 20  ;;  %s2502_s18 = smov [#allocation4]  }
   0xf   : > { %s281_s19 = sshll.u32 %s2502_s18, 4  ;;  %s3379_s3 = sld [smem:[#allocation24_spill]]  ;;  %s282_s19 = int_to_ptr.vmem [resolvable:$true] %s281_s19 }
  0x10   : > { %p2594_p3 = pnand %p2018_p0, %p256_p2  ;;  %s3381_s5 = sld [smem:[#allocation25_spill]] }
  0x11   : > { %s2503_s27 = smov [#allocation7]   ;;  %s3371_s29 = smov 128  }
  0x12   : > { %s279_s15 = sshll.u32 %s3377_s1, 4  ;;  %p2081_p4 = pneg %p2594_p3  ;;  %s280_s15 = int_to_ptr.hbm [resolvable:$true] %s279_s15 }
  0x13   : > { %s307_s28 = sshll.u32 %s2503_s27, 4  ;;  %s2505_s13 = smov 8   ;;  %s308_s28 = int_to_ptr.vmem [resolvable:$true] %s307_s28 }
  0x14   : > { %p2605_p5 = pnand %p2081_p4, %p194_p1  ;;  %s2506_s14 = smov [#allocation10]  }
  0x15   : > { %s305_s22 = sshll.u32 %s3379_s3, 4  ;;  %s333_s18 = sshll.u32 %s2506_s14, 4  ;;  %s306_s22 = int_to_ptr.hbm [resolvable:$true] %s305_s22  ;;  %s334_s18 = int_to_ptr.vmem [resolvable:$true] %s333_s18 }
  0x16   : > { %s331_s26 = sshll.u32 %s3381_s5, 4  ;;  %s2507_s20 = smov 256   ;;  %s332_s26 = int_to_ptr.hbm [resolvable:$true] %s331_s26 }
  0x17   : > { %2087 = dma.hbm_to_vmem [thread:$0]  (!%p2605_p5), %s280_s15, 1024, %s282_s19, [#allocation5], %s3371_s29, %s3371_s29, %s2505_s13  }
  0x18   : > { %2093 = dma.hbm_to_vmem [thread:$0]  (!%p2605_p5), %s306_s22, 1024, %s308_s28, [#allocation8], %s3371_s29, %s3371_s29, %s2505_s13  }
  0x19   : > { %s2508_s21 = smov 16   ;;  %s2623_s15 = sadd.s32 1, %s2500_s12  }
  0x1a   : > { %2099 = dma.hbm_to_vmem [thread:$0]  (!%p2605_p5), %s332_s26, 4096, %s334_s18, [#allocation11], %s2507_s20, %s2507_s20, %s2508_s21  }
  0x1b   : > { %s177_s19 = ssub.s32 %s2500_s12, %s2623_s15  ;;  %s180_s24 = sadd.s32 1, %s2496_s11 }
  0x1c   : > { %p178_p6 = scmp.eq.s32.totalorder %s177_s19, 0  ;;  %p187_p7 = scmp.ne.s32.totalorder %s2496_s11, %s2492_s10 }
  0x1d   : > { %p188_p8 = scmp.eq.s32.totalorder %s2500_s12, 0  ;;  %p193_p9 = scmp.ne.s32.totalorder %s2492_s10, %s2488_s30 }
  0x1e   : > { %s2634_s22 = scalar_select %p178_p6, %s2496_s11, %s180_s24  }
  0x1f   : > { %p2636_p10 = por %p188_p8, %p187_p7  ;;  %p2642_p11 = por %p194_p1, %p193_p9 }
  0x20   : > { %3382 = sst [smem:[#allocation21_spill]] %s2634_s22  ;;  %p2117_p12 = scmp.lt.s32.totalorder %s2500_s12, 19 }
  0x21   : > { %s359_s26 = sand.u32 1, %s2500_s12   ;;  %s3372_s28 = sand.u32 1, %s2496_s11  }
  0x22   : > { %s2027_s13 = sshll.u32 %s3372_s28, 12  ;;  %s2048_s14 = sshll.u32 %s2500_s12, 7 }
  0x23   : > { %s368_s20 = scalar_lea.hbm %s3368_s7, %s2048_s14  ;;  %s363_s19 = scalar_lea.vmem [#allocation13], %s2027_s13 }
  0x24   : > { %s369_s21 = sshll.u32 %s368_s20, 4  ;;  %s371_s24 = sshll.u32 %s363_s19, 4  ;;  %s370_s21 = int_to_ptr.hbm [resolvable:$true] %s369_s21  ;;  %s372_s24 = int_to_ptr.vmem [resolvable:$true] %s371_s24 }
  0x25   : > { %p2657_p13 = pnand %p2117_p12, %p2636_p10  ;;  %s3386_s0 = sld [smem:[#allocation22_spill]] }
  0x26   : > { %s2664_s5 = scalar_lea.sflag [#allocation14], %s359_s26  ;;  %s2270_s14 = sshra.s32 %s370_s21, 4  ;;  %s2271_s14 = int_to_ptr.hbm [resolvable:$true] %s2270_s14 }
  0x27   : > { %s2272_s13 = scalar_lea.hbm %s2271_s14, 4096  ;;  %p2274_p2 = pneg %p2657_p13 }
  0x28   : > { %p2273_p0 = scmp.ne.s32.totalorder %s2271_s14, %s2272_s13  ;;  %s2277_s1 = scalar_lea.hbm %s3368_s7, 77824 }
  0x29   : > { %p2278_p7 = scmp.lt.s32.totalorder %s2271_s14, %s3368_s7  ;;  %p2279_p8 = scmp.lt.s32.totalorder %s2277_s1, %s2272_s13 }
  0x2a   : > { %p2275_p4 = pnand %p2274_p2, %p2273_p0 }
  0x2b   : > { %s268_s28 = sshll.u32 %s3386_s0, 4  ;;  %p2280_p9 = por %p2279_p8, %p2278_p7  ;;  %s269_s28 = int_to_ptr.hbm [resolvable:$true] %s268_s28 }
  0x2c   : > { %p2276_p6 = pneg %p2275_p4 }
  0x2e   : > { %p2281_p10 = pnand %p2280_p9, %p2276_p6 }
  0x30   : > { %2284 = shalt.err (!%p2281_p10)
}
  0x31   : > { %s2509_s26 = smov 38912   ;;  %s2510_s20 = smov 2048  }
  0x32   : > { %s3387_s19 = smov 128   ;;  %s294_s18 = sshll.u32 %s3363_s2, 4  ;;  %s295_s18 = int_to_ptr.hbm [resolvable:$true] %s294_s18 }
  0x33   : > { %2106 = dma.hbm_to_vmem [thread:$0]  (!%p2657_p13), %s370_s21, 65536, %s372_s24, %s2664_s5, %s2509_s26, %s2510_s20, %s3387_s19  }
  0x34   : > { %s2511_s22 = smov [#allocation2]   ;;  %s2512_s13 = smov [#allocation6]  }
  0x35   : > { %s270_s14 = sshll.u32 %s2511_s22, 4  ;;  %s296_s1 = sshll.u32 %s2512_s13, 4  ;;  %s271_s14 = int_to_ptr.vmem [resolvable:$true] %s270_s14  ;;  %s297_s1 = int_to_ptr.vmem [resolvable:$true] %s296_s1 }
  0x36   : > { %2084 = dma.hbm_to_vmem [thread:$0]  (!%p2605_p5), %s269_s28, 128, %s271_s14, [#allocation3]  }
  0x37   : > { %s320_s21 = sshll.u32 %s3365_s4, 4  ;;  %s346_s22 = sshll.u32 %s3367_s6, 4  ;;  %s321_s21 = int_to_ptr.hbm [resolvable:$true] %s320_s21  ;;  %s347_s22 = int_to_ptr.hbm [resolvable:$true] %s346_s22 }
  0x38   : > { %2090 = dma.hbm_to_vmem [thread:$0]  (!%p2605_p5), %s295_s18, 16, %s297_s1, [#allocation5]  }
  0x39   : > { %s2513_s26 = smov [#allocation9]   ;;  %s2514_s28 = smov [#allocation12]  }
  0x3a   : > { %s322_s20 = sshll.u32 %s2513_s26, 4  ;;  %s348_s19 = sshll.u32 %s2514_s28, 4  ;;  %s323_s20 = int_to_ptr.vmem [resolvable:$true] %s322_s20  ;;  %s349_s19 = int_to_ptr.vmem [resolvable:$true] %s348_s19 }
  0x3b   : > { %2096 = dma.hbm_to_vmem [thread:$0]  (!%p2605_p5), %s321_s21, 16, %s323_s20, [#allocation8]  }
  0x3c   : > { %s3388_s25 = sand.u32 1, %s2496_s11   ;;  %s2031_s13 = sshll.u32 %s2500_s12, 4 }
  0x3d   : > { %s2030_s14 = sshll.u32 %s3388_s25, 4  ;;  %s389_s0 = scalar_lea.hbm %s3369_s8, %s2031_s13 }
  0x3e   : > { %2102 = dma.hbm_to_vmem [thread:$0]  (!%p2605_p5), %s347_s22, 32, %s349_s19, [#allocation11]  }
  0x3f   : > { %s385_s18 = scalar_lea.vmem [#allocation15], %s2030_s14  ;;  %s391_s24 = sshll.u32 %s389_s0, 4  ;;  %s392_s24 = int_to_ptr.hbm [resolvable:$true] %s391_s24 }
  0x40   : > { %s393_s1 = sshll.u32 %s385_s18, 4  ;;  %s2420_s26 = sshra.s32 %s392_s24, 4  ;;  %s394_s1 = int_to_ptr.vmem [resolvable:$true] %s393_s1  ;;  %s2421_s26 = int_to_ptr.hbm [resolvable:$true] %s2420_s26 }
  0x41   : > { %s2422_s21 = scalar_lea.hbm %s2421_s26, 16  ;;  %s2427_s12 = scalar_lea.hbm %s3369_s8, 304 }
  0x42   : > { %p2423_p12 = scmp.ne.s32.totalorder %s2421_s26, %s2422_s21  ;;  %p2428_p5 = scmp.lt.s32.totalorder %s2421_s26, %s3369_s8 }
  0x43   : > { %p2429_p6 = scmp.lt.s32.totalorder %s2427_s12, %s2422_s21 }
  0x44   : > { %p2425_p0 = pnand %p2423_p12, %p2274_p2 }
  0x45   : > { %p2430_p7 = por %p2429_p6, %p2428_p5 }
  0x46   : > { %p2426_p4 = pneg %p2425_p0 }
  0x48   : > { %p2431_p8 = pnand %p2430_p7, %p2426_p4 }
  0x4a   : > { %2434 = shalt.err (!%p2431_p8)
}
  0x4b   : > { %2109 = dma.hbm_to_vmem [thread:$0]  (!%p2657_p13), %s392_s24, 256, %s394_s1, %s2664_s5  }
  0x4c   : > { %402 = sbr.rel (%p2594_p3) target bundleno = 863 (0x35f), region = 56 }
  0x51   : > { %2467 = dma.done.wait (%p194_p1), [#allocation3], 128  }
  0x52   : > { %2469 = vsyncadd (%p194_p1), [#allocation3], 4294967168 }
  0x53   : > { %2471 = dma.done.wait (%p194_p1), [#allocation5], 1040  }
  0x54   : > { %2473 = vsyncadd (%p194_p1), [#allocation5], 4294966256 }
  0x55   : > { %2475 = dma.done.wait (%p194_p1), [#allocation8], 1040  }
  0x56   : > { %2477 = vsyncadd (%p194_p1), [#allocation8], 4294966256 }
  0x57   : > { %2479 = dma.done.wait (%p194_p1), [#allocation11], 4128  }
  0x58   : > { %2481 = vsyncadd (%p194_p1), [#allocation11], 4294963168  ;;  %s439_s5 = sand.u32 1, %s2589_s16   ;;  %s441_s17 = sand.u32 1, %s2492_s10  }
  0x59   : > { %s2040_s29 = sshll.u32 %s441_s17, 12  ;;  %s440_s19 = scalar_lea.sflag [#allocation14], %s439_s5 }
  0x5a   : > { %s2738_s25 = scalar_lea.vmem [#allocation13], %s2040_s29 }
  0x5b   : > { %2483 = dma.done.wait (%p2642_p11), %s440_s19, 65792  }
  0x5c   : > { %2485 = vsyncadd (%p2642_p11), %s440_s19, 4294901504  ;;  %v510_v0 = vld [vmem:[#allocation4 + $0x38] sm:$0xff]  ;;  %v509_v1 = vld [vmem:[#allocation4 + $0x30] sm:$0xff]  ;;  %vm515_vm0 = vcmask 523264   ;;  %s3114_s27 = sshll.u32 %s441_s17, 4  ;;  %s2042_s14 = sshll.u32 %s2589_s16, 4 }
  0x5d   : > { %527 = vmatpush.msra.mxu0 %v510_v0  ;;  %v508_v2 = vld [vmem:[#allocation4 + $0x28] sm:$0xff]  ;;  %v547_v3 = vld [vmem:[#allocation7 + $0x38] sm:$0xff]  ;;  %v546_v4 = vld [vmem:[#allocation7 + $0x30] sm:$0xff]  ;;  %p3125_p1 = scmp.lt.s32.totalorder %s2042_s14, 303  ;;  %s453_s18 = scalar_lea.vmem [#allocation15], %s3114_s27 }
  0x5e   : > { %v507_v5 = vld [vmem:[#allocation4 + $0x20] sm:$0xff]  ;;  %563 = vmatpush.msra.mxu1 %v547_v3  ;;  %v545_v6 = vld [vmem:[#allocation7 + $0x28] sm:$0xff]  ;;  %v506_v7 = vld [vmem:[#allocation4 + $0x18] sm:$0xff] }
  0x5f   : > { %528 = vmatpush.msra.mxu0 %v509_v1  ;;  %v505_v8 = vld [vmem:[#allocation4 + $0x10] sm:$0xff]  ;;  %v504_v9 = vld [vmem:[#allocation4 + $0x8] sm:$0xff]  ;;  %v503_v10 = vld [vmem:[#allocation4] sm:$0xff]  ;;  %s3396_s14 = smov (!%p3125_p1, %s2042_s14), 303 }
  0x60   : > { %564 = vmatpush.msra.mxu1 %v546_v4  ;;  %v502_v11 = vld [vmem:[#allocation2] sm:$0xff]  ;;  %v544_v12 = vld [vmem:[#allocation7 + $0x20] sm:$0xff]  ;;  %v541_v15 = vld [vmem:[#allocation7 + $0x8] sm:$0xff]  ;;  %s2043_s16 = sshll.u32 %s3396_s14, 3 }
  0x61   : > { %529 = vmatpush.msra.mxu0 %v508_v2  ;;  %v543_v13 = vld [vmem:[#allocation7 + $0x18] sm:$0xff]  ;;  %v542_v14 = vld [vmem:[#allocation7 + $0x10] sm:$0xff]  ;;  %v540_v16 = vld [vmem:[#allocation7] sm:$0xff]  ;;  %s3167_s30 = scalar_lea.vmem %s3370_s9, %s2043_s16 }
  0x62   : > { %565 = vmatpush.msra.mxu1 %v545_v6  ;;  %v606_v17 = vld [vmem:[#allocation10 + $0xf0] sm:$0xff]  ;;  %v607_v18 = vld [vmem:[#allocation10 + $0xf8] sm:$0xff]  ;;  %v604_v19 = vld [vmem:[#allocation10 + $0xe0] sm:$0xff] }
  0x63   : > { %530 = vmatpush.msra.mxu0 %v507_v5  ;;  %614 = vmatpush.msra.mxu2 %v606_v17  ;;  %v605_v20 = vld [vmem:[#allocation10 + $0xe8] sm:$0xff]  ;;  %v602_v21 = vld [vmem:[#allocation10 + $0xd0] sm:$0xff]  ;;  %v603_v22 = vld [vmem:[#allocation10 + $0xd8] sm:$0xff] }
  0x64   : > { %566 = vmatpush.msra.mxu1 %v544_v12  ;;  %634 = vmatpush.msra.mxu3 %v607_v18  ;;  %v600_v23 = vld [vmem:[#allocation10 + $0xc0] sm:$0xff]  ;;  %v601_v24 = vld [vmem:[#allocation10 + $0xc8] sm:$0xff]  ;;  %v598_v25 = vld [vmem:[#allocation10 + $0xb0] sm:$0xff] }
  0x65   : > { %531 = vmatpush.msra.mxu0 %v506_v7  ;;  %615 = vmatpush.msra.mxu2 %v604_v19  ;;  %v599_v26 = vld [vmem:[#allocation10 + $0xb8] sm:$0xff]  ;;  %v596_v27 = vld [vmem:[#allocation10 + $0xa0] sm:$0xff]  ;;  %v597_v28 = vld [vmem:[#allocation10 + $0xa8] sm:$0xff] }
  0x66   : > { %567 = vmatpush.msra.mxu1 %v543_v13  ;;  %635 = vmatpush.msra.mxu3 %v605_v20  ;;  %v594_v29 = vld [vmem:[#allocation10 + $0x90] sm:$0xff]  ;;  %v595_v30 = vld [vmem:[#allocation10 + $0x98] sm:$0xff]  ;;  %v592_v31 = vld [vmem:[#allocation10 + $0x80] sm:$0xff] }
  0x67   : > { %532 = vmatpush.msra.mxu0 %v505_v8  ;;  %616 = vmatpush.msra.mxu2 %v602_v21  ;;  %v593_v32 = vld [vmem:[#allocation10 + $0x88] sm:$0xff]  ;;  %v590_v33 = vld [vmem:[#allocation10 + $0x70] sm:$0xff]  ;;  %v591_v34 = vld [vmem:[#allocation10 + $0x78] sm:$0xff] }
  0x68   : > { %568 = vmatpush.msra.mxu1 %v542_v14  ;;  %636 = vmatpush.msra.mxu3 %v603_v22  ;;  %v588_v35 = vld [vmem:[#allocation10 + $0x60] sm:$0xff]  ;;  %v589_v36 = vld [vmem:[#allocation10 + $0x68] sm:$0xff]  ;;  %v586_v37 = vld [vmem:[#allocation10 + $0x50] sm:$0xff] }
  0x69   : > { %533 = vmatpush.msra.mxu0 %v504_v9  ;;  %617 = vmatpush.msra.mxu2 %v600_v23  ;;  %v587_v38 = vld [vmem:[#allocation10 + $0x58] sm:$0xff]  ;;  %v584_v43 = vld [vmem:[#allocation10 + $0x40] sm:$0xff]  ;;  %v585_v44 = vld [vmem:[#allocation10 + $0x48] sm:$0xff] }
  0x6a   : > { %569 = vmatpush.msra.mxu1 %v541_v15  ;;  %637 = vmatpush.msra.mxu3 %v601_v24  ;;  %v2170_v39 = vld [vmem:[#allocation6] ss:$0 sm:$0xff]  ;;  %v582_v45 = vld [vmem:[#allocation10 + $0x30] sm:$0xff]  ;;  %v580_v47 = vld [vmem:[#allocation10 + $0x20] sm:$0xff] }
  0x6b   : > { %534 = vmatpush.msra.mxu0 %v503_v10  ;;  %618 = vmatpush.msra.mxu2 %v598_v25  ;;  %v583_v46 = vld [vmem:[#allocation10 + $0x38] sm:$0xff]  ;;  %v581_v48 = vld [vmem:[#allocation10 + $0x28] sm:$0xff]  ;;  %v578_v49 = vld [vmem:[#allocation10 + $0x10] sm:$0xff] }
  0x6c   : > { %2044 = vmatmul.msk.f32.vlgmr.msra.gmra.mxu0 %vm515_vm0, %v502_v11  ;;  %570 = vmatpush.msra.mxu1 %v540_v16  ;;  %v579_v50 = vld [vmem:[#allocation10 + $0x18] sm:$0xff]  ;;  %v576_v51 = vld [vmem:[#allocation10] sm:$0xff]  ;;  %v577_v52 = vld [vmem:[#allocation10 + $0x8] sm:$0xff] }
  0x6d   : > { %638 = vmatpush.msra.mxu3 %v599_v26  ;;  %619 = vmatpush.msra.mxu2 %v596_v27  ;;  %v896_v53 = vld [vmem:[%s2738_s25 + $0x780] sm:$0xff]  ;;  %v897_v55 = vld [vmem:[%s2738_s25 + $0x788] sm:$0xff] }
  0x6e   : > { %v1152_v54 = vld [vmem:[%s2738_s25 + $0xf80] sm:$0xff]  ;;  %1204 = vmatpush.msrb.mxu0 %v896_v53  ;;  %v1153_v56 = vld [vmem:[%s2738_s25 + $0xf88] sm:$0xff] }
  0x6f   : > { %639 = vmatpush.msra.mxu3 %v597_v28  ;;  %620 = vmatpush.msra.mxu2 %v594_v29  ;;  %v880_v57 = vld [vmem:[%s2738_s25 + $0x700] sm:$0xff]  ;;  %v881_v59 = vld [vmem:[%s2738_s25 + $0x708] sm:$0xff] }
  0x70   : > { %1224 = vmatpush.msrb.mxu1 %v1152_v54  ;;  %v1136_v58 = vld [vmem:[%s2738_s25 + $0xf00] sm:$0xff]  ;;  %v1137_v60 = vld [vmem:[%s2738_s25 + $0xf08] sm:$0xff]  ;;  %1205 = vmatpush.msrb.mxu0 %v880_v57  ;;  %v898_v57 = vld [vmem:[%s2738_s25 + $0x790] sm:$0xff] }
  0x71   : > { %640 = vmatpush.msra.mxu3 %v595_v30  ;;  %621 = vmatpush.msra.mxu2 %v592_v31  ;;  %v864_v61 = vld [vmem:[%s2738_s25 + $0x680] sm:$0xff]  ;;  %v865_v63 = vld [vmem:[%s2738_s25 + $0x688] sm:$0xff]  ;;  %v2171_v31 = vld [vmem:[#allocation9] ss:$0 sm:$0xff] }
  0x72   : > { %1225 = vmatpush.msrb.mxu1 %v1136_v58  ;;  %v1120_v62 = vld [vmem:[%s2738_s25 + $0xe80] sm:$0xff]  ;;  %v1121_v0 = vld [vmem:[%s2738_s25 + $0xe88] sm:$0xff]  ;;  %1206 = vmatpush.msrb.mxu0 %v864_v61  ;;  %v1154_v58 = vld [vmem:[%s2738_s25 + $0xf90] sm:$0xff] }
  0x73   : > { %641 = vmatpush.msra.mxu3 %v593_v32  ;;  %622 = vmatpush.msra.mxu2 %v590_v33  ;;  %v848_v1 = vld [vmem:[%s2738_s25 + $0x600] sm:$0xff]  ;;  %v849_v3 = vld [vmem:[%s2738_s25 + $0x608] sm:$0xff]  ;;  %v882_v61 = vld [vmem:[%s2738_s25 + $0x710] sm:$0xff] }
  0x74   : > { %v1104_v2 = vld [vmem:[%s2738_s25 + $0xe00] sm:$0xff]  ;;  %1226 = vmatpush.msrb.mxu1 %v1120_v62  ;;  %v1105_v4 = vld [vmem:[%s2738_s25 + $0xe08] sm:$0xff]  ;;  %1207 = vmatpush.msrb.mxu0 %v848_v1  ;;  %v1138_v62 = vld [vmem:[%s2738_s25 + $0xf10] sm:$0xff] }
  0x75   : > { %642 = vmatpush.msra.mxu3 %v591_v34  ;;  %623 = vmatpush.msra.mxu2 %v588_v35  ;;  %v832_v5 = vld [vmem:[%s2738_s25 + $0x580] sm:$0xff]  ;;  %v833_v7 = vld [vmem:[%s2738_s25 + $0x588] sm:$0xff]  ;;  %v866_v1 = vld [vmem:[%s2738_s25 + $0x690] sm:$0xff] }
  0x76   : > { %v1088_v6 = vld [vmem:[%s2738_s25 + $0xd80] sm:$0xff]  ;;  %1227 = vmatpush.msrb.mxu1 %v1104_v2  ;;  %v1089_v8 = vld [vmem:[%s2738_s25 + $0xd88] sm:$0xff]  ;;  %1208 = vmatpush.msrb.mxu0 %v832_v5  ;;  %v1122_v2 = vld [vmem:[%s2738_s25 + $0xe90] sm:$0xff] }
  0x77   : > { %643 = vmatpush.msra.mxu3 %v589_v36  ;;  %624 = vmatpush.msra.mxu2 %v586_v37  ;;  %v816_v9 = vld [vmem:[%s2738_s25 + $0x500] sm:$0xff]  ;;  %v817_v11 = vld [vmem:[%s2738_s25 + $0x508] sm:$0xff]  ;;  %v850_v5 = vld [vmem:[%s2738_s25 + $0x610] sm:$0xff] }
  0x78   : > { %v1072_v10 = vld [vmem:[%s2738_s25 + $0xd00] sm:$0xff]  ;;  %1228 = vmatpush.msrb.mxu1 %v1088_v6  ;;  %v1073_v12 = vld [vmem:[%s2738_s25 + $0xd08] sm:$0xff]  ;;  %1209 = vmatpush.msrb.mxu0 %v816_v9  ;;  %v1106_v6 = vld [vmem:[%s2738_s25 + $0xe10] sm:$0xff] }
  0x79   : > { %644 = vmatpush.msra.mxu3 %v587_v38  ;;  %625 = vmatpush.msra.mxu2 %v584_v43  ;;  %v800_v13 = vld [vmem:[%s2738_s25 + $0x480] sm:$0xff]  ;;  %v801_v15 = vld [vmem:[%s2738_s25 + $0x488] sm:$0xff]  ;;  %v834_v9 = vld [vmem:[%s2738_s25 + $0x590] sm:$0xff] }
  0x7a   : > { %v1056_v14 = vld [vmem:[%s2738_s25 + $0xc80] sm:$0xff]  ;;  %1229 = vmatpush.msrb.mxu1 %v1072_v10  ;;  %v1057_v16 = vld [vmem:[%s2738_s25 + $0xc88] sm:$0xff]  ;;  %1210 = vmatpush.msrb.mxu0 %v800_v13  ;;  %v1090_v10 = vld [vmem:[%s2738_s25 + $0xd90] sm:$0xff] }
  0x7b   : > { %645 = vmatpush.msra.mxu3 %v585_v44  ;;  %626 = vmatpush.msra.mxu2 %v582_v45  ;;  %v784_v17 = vld [vmem:[%s2738_s25 + $0x400] sm:$0xff]  ;;  %v785_v19 = vld [vmem:[%s2738_s25 + $0x408] sm:$0xff]  ;;  %v818_v13 = vld [vmem:[%s2738_s25 + $0x510] sm:$0xff] }
  0x7c   : > { %v1040_v18 = vld [vmem:[%s2738_s25 + $0xc00] sm:$0xff]  ;;  %1230 = vmatpush.msrb.mxu1 %v1056_v14  ;;  %v1041_v20 = vld [vmem:[%s2738_s25 + $0xc08] sm:$0xff]  ;;  %1211 = vmatpush.msrb.mxu0 %v784_v17  ;;  %v1074_v14 = vld [vmem:[%s2738_s25 + $0xd10] sm:$0xff] }
  0x7d   : > { %646 = vmatpush.msra.mxu3 %v583_v46  ;;  %627 = vmatpush.msra.mxu2 %v580_v47  ;;  %v768_v21 = vld [vmem:[%s2738_s25 + $0x380] sm:$0xff]  ;;  %v769_v23 = vld [vmem:[%s2738_s25 + $0x388] sm:$0xff]  ;;  %v802_v17 = vld [vmem:[%s2738_s25 + $0x490] sm:$0xff] }
  0x7e   : > { %v1024_v22 = vld [vmem:[%s2738_s25 + $0xb80] sm:$0xff]  ;;  %1231 = vmatpush.msrb.mxu1 %v1040_v18  ;;  %v1025_v24 = vld [vmem:[%s2738_s25 + $0xb88] sm:$0xff]  ;;  %1212 = vmatpush.msrb.mxu0 %v768_v21  ;;  %v1058_v18 = vld [vmem:[%s2738_s25 + $0xc90] sm:$0xff] }
  0x7f   : > { %647 = vmatpush.msra.mxu3 %v581_v48  ;;  %628 = vmatpush.msra.mxu2 %v578_v49  ;;  %v752_v25 = vld [vmem:[%s2738_s25 + $0x300] sm:$0xff]  ;;  %v753_v27 = vld [vmem:[%s2738_s25 + $0x308] sm:$0xff]  ;;  %v786_v21 = vld [vmem:[%s2738_s25 + $0x410] sm:$0xff] }
  0x80   : > { %v1008_v26 = vld [vmem:[%s2738_s25 + $0xb00] sm:$0xff]  ;;  %1232 = vmatpush.msrb.mxu1 %v1024_v22  ;;  %v1009_v28 = vld [vmem:[%s2738_s25 + $0xb08] sm:$0xff]  ;;  %1213 = vmatpush.msrb.mxu0 %v752_v25  ;;  %v1042_v22 = vld [vmem:[%s2738_s25 + $0xc10] sm:$0xff] }
  0x81   : > { %648 = vmatpush.msra.mxu3 %v579_v50  ;;  %629 = vmatpush.msra.mxu2 %v576_v51  ;;  %v736_v29 = vld [vmem:[%s2738_s25 + $0x280] sm:$0xff]  ;;  %v737_v32 = vld [vmem:[%s2738_s25 + $0x288] sm:$0xff]  ;;  %v770_v25 = vld [vmem:[%s2738_s25 + $0x390] sm:$0xff] }
  0x82   : > { %v992_v30 = vld [vmem:[%s2738_s25 + $0xa80] sm:$0xff]  ;;  %1233 = vmatpush.msrb.mxu1 %v1008_v26  ;;  %v993_v33 = vld [vmem:[%s2738_s25 + $0xa88] sm:$0xff]  ;;  %1214 = vmatpush.msrb.mxu0 %v736_v29  ;;  %v1026_v26 = vld [vmem:[%s2738_s25 + $0xb90] sm:$0xff] }
  0x83   : > { %649 = vmatpush.msra.mxu3 %v577_v52  ;;  %1244 = vmatpush.msrb.mxu2 %v897_v55  ;;  %v720_v34 = vld [vmem:[%s2738_s25 + $0x200] sm:$0xff]  ;;  %v721_v36 = vld [vmem:[%s2738_s25 + $0x208] sm:$0xff]  ;;  %v754_v29 = vld [vmem:[%s2738_s25 + $0x310] sm:$0xff] }
  0x84   : > { %v976_v35 = vld [vmem:[%s2738_s25 + $0xa00] sm:$0xff]  ;;  %1234 = vmatpush.msrb.mxu1 %v992_v30  ;;  %v977_v37 = vld [vmem:[%s2738_s25 + $0xa08] sm:$0xff]  ;;  %1215 = vmatpush.msrb.mxu0 %v720_v34  ;;  %v1010_v30 = vld [vmem:[%s2738_s25 + $0xb10] sm:$0xff] }
  0x85   : > { %1264 = vmatpush.msrb.mxu3 %v1153_v56  ;;  %1245 = vmatpush.msrb.mxu2 %v881_v59  ;;  %v961_v43 = vld [vmem:[%s2738_s25 + $0x988] sm:$0xff]  ;;  %v688_v44 = vld [vmem:[%s2738_s25 + $0x100] sm:$0xff]  ;;  %v899_v59 = vld [vmem:[%s2738_s25 + $0x798] sm:$0xff] }
  0x86   : > { %1235 = vmatpush.msrb.mxu1 %v976_v35  ;;  %v944_v45 = vld [vmem:[%s2738_s25 + $0x900] sm:$0xff]  ;;  %v689_v46 = vld [vmem:[%s2738_s25 + $0x108] sm:$0xff]  ;;  %v994_v34 = vld [vmem:[%s2738_s25 + $0xa90] sm:$0xff] }
  0x87   : > { %1265 = vmatpush.msrb.mxu3 %v1137_v60  ;;  %1246 = vmatpush.msrb.mxu2 %v865_v63  ;;  %v945_v47 = vld [vmem:[%s2738_s25 + $0x908] sm:$0xff]  ;;  %v672_v48 = vld [vmem:[%s2738_s25 + $0x80] sm:$0xff]  ;;  %v1155_v60 = vld [vmem:[%s2738_s25 + $0xf98] sm:$0xff] }
  0x88   : > { %v928_v49 = vld [vmem:[%s2738_s25 + $0x880] sm:$0xff]  ;;  %v673_v50 = vld [vmem:[%s2738_s25 + $0x88] sm:$0xff]  ;;  %v883_v63 = vld [vmem:[%s2738_s25 + $0x718] sm:$0xff] }
  0x89   : > { %1266 = vmatpush.msrb.mxu3 %v1121_v0  ;;  %1247 = vmatpush.msrb.mxu2 %v849_v3  ;;  %v929_v51 = vld [vmem:[%s2738_s25 + $0x888] sm:$0xff]  ;;  %v656_v52 = vld [vmem:[%s2738_s25] sm:$0xff]  ;;  %v1139_v0 = vld [vmem:[%s2738_s25 + $0xf18] sm:$0xff] }
  0x8a   : > { %v912_v53 = vld [vmem:[%s2738_s25 + $0x800] sm:$0xff]  ;;  %v657_v54 = vld [vmem:[%s2738_s25 + $0x8] sm:$0xff]  ;;  %v867_v3 = vld [vmem:[%s2738_s25 + $0x698] sm:$0xff] }
  0x8b   : > { %1267 = vmatpush.msrb.mxu3 %v1105_v4  ;;  %1248 = vmatpush.msrb.mxu2 %v833_v7  ;;  %v913_v55 = vld [vmem:[%s2738_s25 + $0x808] sm:$0xff]  ;;  %v1123_v4 = vld [vmem:[%s2738_s25 + $0xe98] sm:$0xff] }
  0x8c   : > { %v851_v7 = vld [vmem:[%s2738_s25 + $0x618] sm:$0xff] }
  0x8d   : > { %1268 = vmatpush.msrb.mxu3 %v1089_v8  ;;  %1249 = vmatpush.msrb.mxu2 %v817_v11  ;;  %v1107_v8 = vld [vmem:[%s2738_s25 + $0xe18] sm:$0xff] }
  0x8e   : > { %v835_v11 = vld [vmem:[%s2738_s25 + $0x598] sm:$0xff] }
  0x8f   : > { %1269 = vmatpush.msrb.mxu3 %v1073_v12  ;;  %1250 = vmatpush.msrb.mxu2 %v801_v15  ;;  %v1091_v12 = vld [vmem:[%s2738_s25 + $0xd98] sm:$0xff] }
  0x90   : > { %v819_v15 = vld [vmem:[%s2738_s25 + $0x518] sm:$0xff] }
  0x91   : > { %1270 = vmatpush.msrb.mxu3 %v1057_v16  ;;  %1251 = vmatpush.msrb.mxu2 %v785_v19  ;;  %v1075_v16 = vld [vmem:[%s2738_s25 + $0xd18] sm:$0xff] }
  0x92   : > { %v803_v19 = vld [vmem:[%s2738_s25 + $0x498] sm:$0xff] }
  0x93   : > { %1271 = vmatpush.msrb.mxu3 %v1041_v20  ;;  %1252 = vmatpush.msrb.mxu2 %v769_v23  ;;  %v1059_v20 = vld [vmem:[%s2738_s25 + $0xc98] sm:$0xff] }
  0x94   : > { %v787_v23 = vld [vmem:[%s2738_s25 + $0x418] sm:$0xff] }
  0x95   : > { %1272 = vmatpush.msrb.mxu3 %v1025_v24  ;;  %1253 = vmatpush.msrb.mxu2 %v753_v27  ;;  %v1043_v24 = vld [vmem:[%s2738_s25 + $0xc18] sm:$0xff] }
  0x96   : > { %v771_v27 = vld [vmem:[%s2738_s25 + $0x398] sm:$0xff] }
  0x97   : > { %1273 = vmatpush.msrb.mxu3 %v1009_v28  ;;  %1254 = vmatpush.msrb.mxu2 %v737_v32  ;;  %v1027_v28 = vld [vmem:[%s2738_s25 + $0xb98] sm:$0xff] }
  0x98   : > { %v1011_v32 = vld [vmem:[%s2738_s25 + $0xb18] sm:$0xff] }
  0x99   : > { %1274 = vmatpush.msrb.mxu3 %v993_v33  ;;  %1255 = vmatpush.msrb.mxu2 %v721_v36  ;;  %v738_v33 = vld [vmem:[%s2738_s25 + $0x290] sm:$0xff]  ;;  %v739_v35 = vld [vmem:[%s2738_s25 + $0x298] sm:$0xff] }
  0x9a   : > { %v995_v36 = vld [vmem:[%s2738_s25 + $0xa98] sm:$0xff] }
  0x9b   : > { %1275 = vmatpush.msrb.mxu3 %v977_v37  ;;  %v722_v37 = vld [vmem:[%s2738_s25 + $0x210] sm:$0xff] }
  0x9d   : > { %1276 = vmatpush.msrb.mxu3 %v961_v43  ;;  %v707_v43 = vld [vmem:[%s2738_s25 + $0x198] sm:$0xff] }
  0x9f   : > { %1277 = vmatpush.msrb.mxu3 %v945_v47  ;;  %v691_v47 = vld [vmem:[%s2738_s25 + $0x118] sm:$0xff] }
  0xa1   : > { %1278 = vmatpush.msrb.mxu3 %v929_v51  ;;  %v675_v51 = vld [vmem:[%s2738_s25 + $0x98] sm:$0xff] }
  0xa3   : > { %1279 = vmatpush.msrb.mxu3 %v913_v55  ;;  %v659_v55 = vld [vmem:[%s2738_s25 + $0x18] sm:$0xff] }
  0xe9   : > { %v536_v40 = vpop.f32.mrf.mxu0 }
  0xea   : > { %v537_v41 = vadd.f32 %v2170_v39, %v536_v40  ;;  %v704_v39 = vld [vmem:[%s2738_s25 + $0x180] sm:$0xff] }
  0xeb   : > { %v960_v40 = vld [vmem:[%s2738_s25 + $0x980] sm:$0xff]  ;;  %1216 = vmatpush.msrb.mxu0 %v704_v39  ;;  %v723_v39 = vld [vmem:[%s2738_s25 + $0x218] sm:$0xff] }
  0xec   : > { %2172 = vtanh.f32 %v537_v41  ;;  %1236 = vmatpush.msrb.mxu1 %v960_v40  ;;  %v979_v40 = vld [vmem:[%s2738_s25 + $0xa18] sm:$0xff] }
  0xed   : > { %1217 = vmatpush.msrb.mxu0 %v688_v44  ;;  %v963_v44 = vld [vmem:[%s2738_s25 + $0x998] sm:$0xff] }
  0xee   : > { %1237 = vmatpush.msrb.mxu1 %v944_v45  ;;  %v690_v45 = vld [vmem:[%s2738_s25 + $0x110] sm:$0xff] }
  0xef   : > { %1218 = vmatpush.msrb.mxu0 %v672_v48  ;;  %v947_v48 = vld [vmem:[%s2738_s25 + $0x918] sm:$0xff] }
  0xf0   : > { %1238 = vmatpush.msrb.mxu1 %v928_v49  ;;  %v674_v49 = vld [vmem:[%s2738_s25 + $0x90] sm:$0xff] }
  0xf1   : > { %1219 = vmatpush.msrb.mxu0 %v656_v52  ;;  %v931_v52 = vld [vmem:[%s2738_s25 + $0x898] sm:$0xff] }
  0xf2   : > { %v2173_v42 = vpop.eup %2172  ;;  %1239 = vmatpush.msrb.mxu1 %v912_v53  ;;  %v658_v53 = vld [vmem:[%s2738_s25 + $0x10] sm:$0xff] }
  0xf3   : > { %2045 = vmatmul.msk.f32.vlgmr.msra.gmra.mxu1 %vm515_vm0, %v2173_v42  ;;  %v705_v42 = vld [vmem:[%s2738_s25 + $0x188] sm:$0xff]  ;;  %1284 = vmatpush.msra.mxu0 %v898_v57  ;;  %v608_v57 = vld [vmem:[#allocation12] sm:$0x3] }
  0xf4   : > { %1256 = vmatpush.msrb.mxu2 %v705_v42  ;;  %1304 = vmatpush.msra.mxu1 %v1154_v58  ;;  %v962_v42 = vld [vmem:[%s2738_s25 + $0x990] sm:$0xff]  ;;  %v610_v58 = vperm.slane %v608_v57, 0 }
  0xf5   : > { %1285 = vmatpush.msra.mxu0 %v882_v61 }
  0xf6   : > { %1257 = vmatpush.msrb.mxu2 %v689_v46  ;;  %1305 = vmatpush.msra.mxu1 %v1138_v62  ;;  %v946_v46 = vld [vmem:[%s2738_s25 + $0x910] sm:$0xff] }
  0xf7   : > { %1286 = vmatpush.msra.mxu0 %v866_v1  ;;  %v900_v1 = vld [vmem:[%s2738_s25 + $0x7a0] sm:$0xff] }
  0xf8   : > { %1258 = vmatpush.msrb.mxu2 %v673_v50  ;;  %1306 = vmatpush.msra.mxu1 %v1122_v2  ;;  %v930_v50 = vld [vmem:[%s2738_s25 + $0x890] sm:$0xff]  ;;  %v1156_v2 = vld [vmem:[%s2738_s25 + $0xfa0] sm:$0xff] }
  0xf9   : > { %1287 = vmatpush.msra.mxu0 %v850_v5  ;;  %v1157_v5 = vld [vmem:[%s2738_s25 + $0xfa8] sm:$0xff] }
  0xfa   : > { %1259 = vmatpush.msrb.mxu2 %v657_v54  ;;  %1307 = vmatpush.msra.mxu1 %v1106_v6  ;;  %v914_v54 = vld [vmem:[%s2738_s25 + $0x810] sm:$0xff]  ;;  %v884_v6 = vld [vmem:[%s2738_s25 + $0x720] sm:$0xff] }
  0xfb   : > { %1288 = vmatpush.msra.mxu0 %v834_v9  ;;  %v1141_v9 = vld [vmem:[%s2738_s25 + $0xf28] sm:$0xff] }
  0xfc   : > { %1308 = vmatpush.msra.mxu1 %v1090_v10  ;;  %v868_v10 = vld [vmem:[%s2738_s25 + $0x6a0] sm:$0xff] }
  0xfd   : > { %1289 = vmatpush.msra.mxu0 %v818_v13  ;;  %v1125_v13 = vld [vmem:[%s2738_s25 + $0xea8] sm:$0xff] }
  0xfe   : > { %1309 = vmatpush.msra.mxu1 %v1074_v14  ;;  %v852_v14 = vld [vmem:[%s2738_s25 + $0x620] sm:$0xff] }
  0xff   : > { %1290 = vmatpush.msra.mxu0 %v802_v17  ;;  %v1109_v17 = vld [vmem:[%s2738_s25 + $0xe28] sm:$0xff] }
 0x100   : > { %1310 = vmatpush.msra.mxu1 %v1058_v18  ;;  %v836_v18 = vld [vmem:[%s2738_s25 + $0x5a0] sm:$0xff] }
 0x101   : > { %1291 = vmatpush.msra.mxu0 %v786_v21  ;;  %v1093_v21 = vld [vmem:[%s2738_s25 + $0xda8] sm:$0xff] }
 0x102   : > { %1311 = vmatpush.msra.mxu1 %v1042_v22  ;;  %v820_v22 = vld [vmem:[%s2738_s25 + $0x520] sm:$0xff] }
 0x103   : > { %1292 = vmatpush.msra.mxu0 %v770_v25  ;;  %v1077_v25 = vld [vmem:[%s2738_s25 + $0xd28] sm:$0xff] }
 0x104   : > { %1312 = vmatpush.msra.mxu1 %v1026_v26  ;;  %v804_v26 = vld [vmem:[%s2738_s25 + $0x4a0] sm:$0xff] }
 0x105   : > { %1293 = vmatpush.msra.mxu0 %v754_v29  ;;  %v1061_v29 = vld [vmem:[%s2738_s25 + $0xca8] sm:$0xff] }
 0x106   : > { %1313 = vmatpush.msra.mxu1 %v1010_v30  ;;  %v788_v30 = vld [vmem:[%s2738_s25 + $0x420] sm:$0xff] }
 0x107   : > { %1294 = vmatpush.msra.mxu0 %v738_v33  ;;  %v1045_v33 = vld [vmem:[%s2738_s25 + $0xc28] sm:$0xff] }
 0x108   : > { %1314 = vmatpush.msra.mxu1 %v994_v34  ;;  %v772_v34 = vld [vmem:[%s2738_s25 + $0x3a0] sm:$0xff] }
 0x109   : > { %1295 = vmatpush.msra.mxu0 %v722_v37  ;;  %v1029_v37 = vld [vmem:[%s2738_s25 + $0xba8] sm:$0xff] }
 0x170   : > { %v572_v38 = vpop.f32.mrf.mxu1 }
 0x171   : > { %v573_v41 = vadd.f32 %v2171_v31, %v572_v38  ;;  %v755_v31 = vld [vmem:[%s2738_s25 + $0x318] sm:$0xff]  ;;  %v978_v38 = vld [vmem:[%s2738_s25 + $0xa10] sm:$0xff] }
 0x172   : > { %1315 = vmatpush.msra.mxu1 %v978_v38  ;;  %v756_v38 = vld [vmem:[%s2738_s25 + $0x320] sm:$0xff] }
 0x173   : > { %2174 = vtanh.f32 %v573_v41  ;;  %v706_v41 = vld [vmem:[%s2738_s25 + $0x190] sm:$0xff] }
 0x174   : > { %1296 = vmatpush.msra.mxu0 %v706_v41  ;;  %1316 = vmatpush.msra.mxu1 %v962_v42  ;;  %v1013_v41 = vld [vmem:[%s2738_s25 + $0xb28] sm:$0xff]  ;;  %v740_v42 = vld [vmem:[%s2738_s25 + $0x2a0] sm:$0xff] }
 0x176   : > { %1297 = vmatpush.msra.mxu0 %v690_v45  ;;  %1317 = vmatpush.msra.mxu1 %v946_v46  ;;  %v997_v45 = vld [vmem:[%s2738_s25 + $0xaa8] sm:$0xff]  ;;  %v724_v46 = vld [vmem:[%s2738_s25 + $0x220] sm:$0xff] }
 0x178   : > { %1298 = vmatpush.msra.mxu0 %v674_v49  ;;  %1318 = vmatpush.msra.mxu1 %v930_v50  ;;  %v981_v49 = vld [vmem:[%s2738_s25 + $0xa28] sm:$0xff]  ;;  %v708_v50 = vld [vmem:[%s2738_s25 + $0x1a0] sm:$0xff] }
 0x179   : > { %v2175_v56 = vpop.eup %2174 }
 0x17a   : > { %630 = vmatmul.f32.vlgmr.msra.gmra.mxu2 %v2175_v56  ;;  %650 = vmatmul.f32.vlgmr.msra.gmra.mxu3 %v2175_v56  ;;  %v915_v56 = vld [vmem:[%s2738_s25 + $0x818] sm:$0xff] }
 0x17b   : > { %1324 = vmatpush.msra.mxu2 %v899_v59  ;;  %1344 = vmatpush.msra.mxu3 %v1155_v60  ;;  %v611_v59 = vperm.slane %v608_v57, 1  ;;  %v949_v57 = vld [vmem:[%s2738_s25 + $0x928] sm:$0xff] }
 0x17c   : > { %1299 = vmatpush.msra.mxu0 %v658_v53  ;;  %1319 = vmatpush.msra.mxu1 %v914_v54  ;;  %v965_v53 = vld [vmem:[%s2738_s25 + $0x9a8] sm:$0xff]  ;;  %v692_v54 = vld [vmem:[%s2738_s25 + $0x120] sm:$0xff] }
 0x17d   : > { %1325 = vmatpush.msra.mxu2 %v883_v63  ;;  %1345 = vmatpush.msra.mxu3 %v1139_v0 }
 0x17f   : > { %1326 = vmatpush.msra.mxu2 %v867_v3  ;;  %1346 = vmatpush.msra.mxu3 %v1123_v4  ;;  %v901_v4 = vld [vmem:[%s2738_s25 + $0x7a8] sm:$0xff] }
 0x181   : > { %1327 = vmatpush.msra.mxu2 %v851_v7  ;;  %1347 = vmatpush.msra.mxu3 %v1107_v8  ;;  %v1140_v7 = vld [vmem:[%s2738_s25 + $0xf20] sm:$0xff]  ;;  %v885_v8 = vld [vmem:[%s2738_s25 + $0x728] sm:$0xff] }
 0x183   : > { %1328 = vmatpush.msra.mxu2 %v835_v11  ;;  %1348 = vmatpush.msra.mxu3 %v1091_v12  ;;  %v1124_v11 = vld [vmem:[%s2738_s25 + $0xea0] sm:$0xff]  ;;  %v869_v12 = vld [vmem:[%s2738_s25 + $0x6a8] sm:$0xff] }
 0x185   : > { %1329 = vmatpush.msra.mxu2 %v819_v15  ;;  %1349 = vmatpush.msra.mxu3 %v1075_v16  ;;  %v1108_v15 = vld [vmem:[%s2738_s25 + $0xe20] sm:$0xff]  ;;  %v853_v16 = vld [vmem:[%s2738_s25 + $0x628] sm:$0xff] }
 0x187   : > { %1330 = vmatpush.msra.mxu2 %v803_v19  ;;  %1350 = vmatpush.msra.mxu3 %v1059_v20  ;;  %v1092_v19 = vld [vmem:[%s2738_s25 + $0xda0] sm:$0xff]  ;;  %v837_v20 = vld [vmem:[%s2738_s25 + $0x5a8] sm:$0xff] }
 0x189   : > { %1331 = vmatpush.msra.mxu2 %v787_v23  ;;  %1351 = vmatpush.msra.mxu3 %v1043_v24  ;;  %v1076_v23 = vld [vmem:[%s2738_s25 + $0xd20] sm:$0xff]  ;;  %v821_v24 = vld [vmem:[%s2738_s25 + $0x528] sm:$0xff] }
 0x18b   : > { %1332 = vmatpush.msra.mxu2 %v771_v27  ;;  %1352 = vmatpush.msra.mxu3 %v1027_v28  ;;  %v1060_v27 = vld [vmem:[%s2738_s25 + $0xca0] sm:$0xff]  ;;  %v805_v28 = vld [vmem:[%s2738_s25 + $0x4a8] sm:$0xff] }
 0x18d   : > { %1333 = vmatpush.msra.mxu2 %v755_v31  ;;  %1353 = vmatpush.msra.mxu3 %v1011_v32  ;;  %v1044_v31 = vld [vmem:[%s2738_s25 + $0xc20] sm:$0xff]  ;;  %v789_v32 = vld [vmem:[%s2738_s25 + $0x428] sm:$0xff] }
 0x18f   : > { %1334 = vmatpush.msra.mxu2 %v739_v35  ;;  %1354 = vmatpush.msra.mxu3 %v995_v36  ;;  %v1028_v35 = vld [vmem:[%s2738_s25 + $0xba0] sm:$0xff]  ;;  %v773_v36 = vld [vmem:[%s2738_s25 + $0x3a8] sm:$0xff] }
 0x191   : > { %1335 = vmatpush.msra.mxu2 %v723_v39  ;;  %1355 = vmatpush.msra.mxu3 %v979_v40  ;;  %v1012_v39 = vld [vmem:[%s2738_s25 + $0xb20] sm:$0xff]  ;;  %v757_v40 = vld [vmem:[%s2738_s25 + $0x328] sm:$0xff] }
 0x193   : > { %1336 = vmatpush.msra.mxu2 %v707_v43  ;;  %1356 = vmatpush.msra.mxu3 %v963_v44  ;;  %v996_v43 = vld [vmem:[%s2738_s25 + $0xaa0] sm:$0xff]  ;;  %v741_v44 = vld [vmem:[%s2738_s25 + $0x2a8] sm:$0xff] }
 0x195   : > { %1337 = vmatpush.msra.mxu2 %v691_v47  ;;  %1357 = vmatpush.msra.mxu3 %v947_v48  ;;  %v980_v47 = vld [vmem:[%s2738_s25 + $0xa20] sm:$0xff]  ;;  %v725_v48 = vld [vmem:[%s2738_s25 + $0x228] sm:$0xff] }
 0x197   : > { %1338 = vmatpush.msra.mxu2 %v675_v51  ;;  %1358 = vmatpush.msra.mxu3 %v931_v52  ;;  %v964_v51 = vld [vmem:[%s2738_s25 + $0x9a0] sm:$0xff]  ;;  %v709_v52 = vld [vmem:[%s2738_s25 + $0x1a8] sm:$0xff] }
 0x199   : > { %1339 = vmatpush.msra.mxu2 %v659_v55  ;;  %1359 = vmatpush.msra.mxu3 %v915_v56  ;;  %v948_v55 = vld [vmem:[%s2738_s25 + $0x920] sm:$0xff]  ;;  %v693_v56 = vld [vmem:[%s2738_s25 + $0x128] sm:$0xff] }
 0x1fd   : > { %v631_v60 = vpop.f32.mrf.mxu2  ;;  %v651_v61 = vpop.f32.mrf.mxu3 }
 0x1fe   : > { %v632_v62 = vadd.f32 %v631_v60, %v610_v58  ;;  %v652_v63 = vadd.f32 %v651_v61, %v611_v59  ;;  %v676_v58 = vld [vmem:[%s2738_s25 + $0xa0] sm:$0xff]  ;;  %v677_v60 = vld [vmem:[%s2738_s25 + $0xa8] sm:$0xff] }
 0x1ff   : > { %v932_v59 = vld [vmem:[%s2738_s25 + $0x8a0] sm:$0xff]  ;;  %v933_v61 = vld [vmem:[%s2738_s25 + $0x8a8] sm:$0xff] }
 0x200   : > { %2176 = vtanh.f32 %v632_v62  ;;  %v660_v62 = vld [vmem:[%s2738_s25 + $0x20] sm:$0xff] }
 0x201   : > { %2178 = vtanh.f32 %v652_v63  ;;  %v916_v63 = vld [vmem:[%s2738_s25 + $0x820] sm:$0xff] }
 0x206   : > { %v2874_v0 = vpop.eup %2176 }
 0x207   : > { %v2878_v3 = vpop.eup %2178  ;;  %1220 = vmatmul.f32.vlgmr.msrb.gmra.mxu0 %v2874_v0  ;;  %1260 = vmatmul.f32.vlgmr.msrb.gmra.mxu2 %v2874_v0 }
 0x208   : > { %1240 = vmatmul.f32.vlgmr.msrb.gmra.mxu1 %v2878_v3  ;;  %1280 = vmatmul.f32.vlgmr.msrb.gmra.mxu3 %v2878_v3 }
 0x209   : > { %1364 = vmatpush.msrb.mxu0 %v900_v1  ;;  %1384 = vmatpush.msrb.mxu1 %v1156_v2  ;;  %v661_v1 = vld [vmem:[%s2738_s25 + $0x28] sm:$0xff] }
 0x20a   : > { %1404 = vmatpush.msrb.mxu2 %v901_v4  ;;  %1424 = vmatpush.msrb.mxu3 %v1157_v5  ;;  %v917_v2 = vld [vmem:[%s2738_s25 + $0x828] sm:$0xff]  ;;  %v902_v4 = vld [vmem:[%s2738_s25 + $0x7b0] sm:$0xff] }
 0x20b   : > { %1365 = vmatpush.msrb.mxu0 %v884_v6  ;;  %1385 = vmatpush.msrb.mxu1 %v1140_v7  ;;  %v1158_v5 = vld [vmem:[%s2738_s25 + $0xfb0] sm:$0xff]  ;;  %v903_v6 = vld [vmem:[%s2738_s25 + $0x7b8] sm:$0xff] }
 0x20c   : > { %1405 = vmatpush.msrb.mxu2 %v885_v8  ;;  %1425 = vmatpush.msrb.mxu3 %v1141_v9  ;;  %v1159_v7 = vld [vmem:[%s2738_s25 + $0xfb8] sm:$0xff]  ;;  %v886_v8 = vld [vmem:[%s2738_s25 + $0x730] sm:$0xff] }
 0x20d   : > { %1366 = vmatpush.msrb.mxu0 %v868_v10  ;;  %1386 = vmatpush.msrb.mxu1 %v1124_v11  ;;  %v1142_v9 = vld [vmem:[%s2738_s25 + $0xf30] sm:$0xff]  ;;  %v887_v10 = vld [vmem:[%s2738_s25 + $0x738] sm:$0xff] }
 0x20e   : > { %1406 = vmatpush.msrb.mxu2 %v869_v12  ;;  %1426 = vmatpush.msrb.mxu3 %v1125_v13  ;;  %v1143_v11 = vld [vmem:[%s2738_s25 + $0xf38] sm:$0xff]  ;;  %v870_v12 = vld [vmem:[%s2738_s25 + $0x6b0] sm:$0xff] }
 0x20f   : > { %1367 = vmatpush.msrb.mxu0 %v852_v14  ;;  %1387 = vmatpush.msrb.mxu1 %v1108_v15  ;;  %v1126_v13 = vld [vmem:[%s2738_s25 + $0xeb0] sm:$0xff]  ;;  %v871_v14 = vld [vmem:[%s2738_s25 + $0x6b8] sm:$0xff] }
 0x210   : > { %1407 = vmatpush.msrb.mxu2 %v853_v16  ;;  %1427 = vmatpush.msrb.mxu3 %v1109_v17  ;;  %v1127_v15 = vld [vmem:[%s2738_s25 + $0xeb8] sm:$0xff]  ;;  %v854_v16 = vld [vmem:[%s2738_s25 + $0x630] sm:$0xff] }
 0x211   : > { %1300 = vmatmul.f32.vlgmr.msra.gmra.mxu0 %v2874_v0  ;;  %1320 = vmatmul.f32.vlgmr.msra.gmra.mxu1 %v2878_v3  ;;  %v1110_v17 = vld [vmem:[%s2738_s25 + $0xe30] sm:$0xff] }
 0x212   : > { %1340 = vmatmul.f32.vlgmr.msra.gmra.mxu2 %v2874_v0  ;;  %1360 = vmatmul.f32.vlgmr.msra.gmra.mxu3 %v2878_v3 }
 0x213   : > { %1368 = vmatpush.msrb.mxu0 %v836_v18  ;;  %1388 = vmatpush.msrb.mxu1 %v1092_v19  ;;  %v855_v18 = vld [vmem:[%s2738_s25 + $0x638] sm:$0xff] }
 0x214   : > { %1408 = vmatpush.msrb.mxu2 %v837_v20  ;;  %1428 = vmatpush.msrb.mxu3 %v1093_v21  ;;  %v1111_v19 = vld [vmem:[%s2738_s25 + $0xe38] sm:$0xff]  ;;  %v838_v20 = vld [vmem:[%s2738_s25 + $0x5b0] sm:$0xff] }
 0x215   : > { %1369 = vmatpush.msrb.mxu0 %v820_v22  ;;  %1389 = vmatpush.msrb.mxu1 %v1076_v23  ;;  %v1094_v21 = vld [vmem:[%s2738_s25 + $0xdb0] sm:$0xff]  ;;  %v839_v22 = vld [vmem:[%s2738_s25 + $0x5b8] sm:$0xff] }
 0x216   : > { %1409 = vmatpush.msrb.mxu2 %v821_v24  ;;  %1429 = vmatpush.msrb.mxu3 %v1077_v25  ;;  %v1095_v23 = vld [vmem:[%s2738_s25 + $0xdb8] sm:$0xff]  ;;  %v822_v24 = vld [vmem:[%s2738_s25 + $0x530] sm:$0xff] }
 0x217   : > { %1370 = vmatpush.msrb.mxu0 %v804_v26  ;;  %1390 = vmatpush.msrb.mxu1 %v1060_v27  ;;  %v1078_v25 = vld [vmem:[%s2738_s25 + $0xd30] sm:$0xff]  ;;  %v823_v26 = vld [vmem:[%s2738_s25 + $0x538] sm:$0xff] }
 0x218   : > { %1410 = vmatpush.msrb.mxu2 %v805_v28  ;;  %1430 = vmatpush.msrb.mxu3 %v1061_v29  ;;  %v1079_v27 = vld [vmem:[%s2738_s25 + $0xd38] sm:$0xff]  ;;  %v806_v28 = vld [vmem:[%s2738_s25 + $0x4b0] sm:$0xff] }
 0x219   : > { %1371 = vmatpush.msrb.mxu0 %v788_v30  ;;  %1391 = vmatpush.msrb.mxu1 %v1044_v31  ;;  %v1062_v29 = vld [vmem:[%s2738_s25 + $0xcb0] sm:$0xff]  ;;  %v807_v30 = vld [vmem:[%s2738_s25 + $0x4b8] sm:$0xff] }
 0x21a   : > { %1411 = vmatpush.msrb.mxu2 %v789_v32  ;;  %1431 = vmatpush.msrb.mxu3 %v1045_v33  ;;  %v1063_v31 = vld [vmem:[%s2738_s25 + $0xcb8] sm:$0xff]  ;;  %v790_v32 = vld [vmem:[%s2738_s25 + $0x430] sm:$0xff] }
 0x21b   : > { %1372 = vmatpush.msrb.mxu0 %v772_v34  ;;  %1392 = vmatpush.msrb.mxu1 %v1028_v35  ;;  %v1046_v33 = vld [vmem:[%s2738_s25 + $0xc30] sm:$0xff]  ;;  %v791_v34 = vld [vmem:[%s2738_s25 + $0x438] sm:$0xff] }
 0x21c   : > { %1412 = vmatpush.msrb.mxu2 %v773_v36  ;;  %1432 = vmatpush.msrb.mxu3 %v1029_v37  ;;  %v1047_v35 = vld [vmem:[%s2738_s25 + $0xc38] sm:$0xff]  ;;  %v774_v36 = vld [vmem:[%s2738_s25 + $0x3b0] sm:$0xff] }
 0x21d   : > { %1373 = vmatpush.msrb.mxu0 %v756_v38  ;;  %1393 = vmatpush.msrb.mxu1 %v1012_v39  ;;  %v1030_v37 = vld [vmem:[%s2738_s25 + $0xbb0] sm:$0xff]  ;;  %v775_v38 = vld [vmem:[%s2738_s25 + $0x3b8] sm:$0xff] }
 0x21e   : > { %1413 = vmatpush.msrb.mxu2 %v757_v40  ;;  %1433 = vmatpush.msrb.mxu3 %v1013_v41  ;;  %v1031_v39 = vld [vmem:[%s2738_s25 + $0xbb8] sm:$0xff]  ;;  %v758_v40 = vld [vmem:[%s2738_s25 + $0x330] sm:$0xff] }
 0x21f   : > { %1374 = vmatpush.msrb.mxu0 %v740_v42  ;;  %1394 = vmatpush.msrb.mxu1 %v996_v43  ;;  %v1014_v41 = vld [vmem:[%s2738_s25 + $0xb30] sm:$0xff]  ;;  %v759_v42 = vld [vmem:[%s2738_s25 + $0x338] sm:$0xff] }
 0x220   : > { %1414 = vmatpush.msrb.mxu2 %v741_v44  ;;  %1434 = vmatpush.msrb.mxu3 %v997_v45  ;;  %v1015_v43 = vld [vmem:[%s2738_s25 + $0xb38] sm:$0xff]  ;;  %v742_v44 = vld [vmem:[%s2738_s25 + $0x2b0] sm:$0xff] }
 0x221   : > { %1375 = vmatpush.msrb.mxu0 %v724_v46  ;;  %1395 = vmatpush.msrb.mxu1 %v980_v47  ;;  %v998_v45 = vld [vmem:[%s2738_s25 + $0xab0] sm:$0xff]  ;;  %v743_v46 = vld [vmem:[%s2738_s25 + $0x2b8] sm:$0xff] }
 0x222   : > { %1415 = vmatpush.msrb.mxu2 %v725_v48  ;;  %1435 = vmatpush.msrb.mxu3 %v981_v49  ;;  %v999_v47 = vld [vmem:[%s2738_s25 + $0xab8] sm:$0xff]  ;;  %v726_v48 = vld [vmem:[%s2738_s25 + $0x230] sm:$0xff] }
 0x223   : > { %1376 = vmatpush.msrb.mxu0 %v708_v50  ;;  %1396 = vmatpush.msrb.mxu1 %v964_v51  ;;  %v982_v49 = vld [vmem:[%s2738_s25 + $0xa30] sm:$0xff]  ;;  %v727_v50 = vld [vmem:[%s2738_s25 + $0x238] sm:$0xff] }
 0x224   : > { %1416 = vmatpush.msrb.mxu2 %v709_v52  ;;  %1436 = vmatpush.msrb.mxu3 %v965_v53  ;;  %v983_v51 = vld [vmem:[%s2738_s25 + $0xa38] sm:$0xff]  ;;  %v710_v52 = vld [vmem:[%s2738_s25 + $0x1b0] sm:$0xff] }
 0x225   : > { %1377 = vmatpush.msrb.mxu0 %v692_v54  ;;  %1397 = vmatpush.msrb.mxu1 %v948_v55  ;;  %v966_v53 = vld [vmem:[%s2738_s25 + $0x9b0] sm:$0xff]  ;;  %v711_v54 = vld [vmem:[%s2738_s25 + $0x1b8] sm:$0xff] }
 0x226   : > { %1417 = vmatpush.msrb.mxu2 %v693_v56  ;;  %1437 = vmatpush.msrb.mxu3 %v949_v57  ;;  %v967_v55 = vld [vmem:[%s2738_s25 + $0x9b8] sm:$0xff]  ;;  %v694_v56 = vld [vmem:[%s2738_s25 + $0x130] sm:$0xff] }
 0x227   : > { %1378 = vmatpush.msrb.mxu0 %v676_v58  ;;  %1398 = vmatpush.msrb.mxu1 %v932_v59  ;;  %v950_v57 = vld [vmem:[%s2738_s25 + $0x930] sm:$0xff]  ;;  %v695_v58 = vld [vmem:[%s2738_s25 + $0x138] sm:$0xff] }
 0x228   : > { %1418 = vmatpush.msrb.mxu2 %v677_v60  ;;  %1438 = vmatpush.msrb.mxu3 %v933_v61  ;;  %v951_v59 = vld [vmem:[%s2738_s25 + $0x938] sm:$0xff]  ;;  %v678_v60 = vld [vmem:[%s2738_s25 + $0xb0] sm:$0xff] }
 0x229   : > { %1379 = vmatpush.msrb.mxu0 %v660_v62  ;;  %1399 = vmatpush.msrb.mxu1 %v916_v63  ;;  %v934_v61 = vld [vmem:[%s2738_s25 + $0x8b0] sm:$0xff]  ;;  %v679_v62 = vld [vmem:[%s2738_s25 + $0xb8] sm:$0xff] }
 0x22a   : > { %1419 = vmatpush.msrb.mxu2 %v661_v1  ;;  %1439 = vmatpush.msrb.mxu3 %v917_v2  ;;  %v935_v63 = vld [vmem:[%s2738_s25 + $0x8b8] sm:$0xff]  ;;  %v662_v1 = vld [vmem:[%s2738_s25 + $0x30] sm:$0xff] }
 0x22b   : > { %1380 = vmatmul.f32.vlgmr.msrb.gmra.mxu0 %v2874_v0  ;;  %1400 = vmatmul.f32.vlgmr.msrb.gmra.mxu1 %v2878_v3  ;;  %v918_v2 = vld [vmem:[%s2738_s25 + $0x830] sm:$0xff] }
 0x22c   : > { %1420 = vmatmul.f32.vlgmr.msrb.gmra.mxu2 %v2874_v0  ;;  %1440 = vmatmul.f32.vlgmr.msrb.gmra.mxu3 %v2878_v3 }
 0x22d   : > { %1444 = vmatpush.msra.mxu0 %v902_v4  ;;  %1464 = vmatpush.msra.mxu1 %v1158_v5  ;;  %v663_v4 = vld [vmem:[%s2738_s25 + $0x38] sm:$0xff] }
 0x22e   : > { %1484 = vmatpush.msra.mxu2 %v903_v6  ;;  %1504 = vmatpush.msra.mxu3 %v1159_v7  ;;  %v919_v5 = vld [vmem:[%s2738_s25 + $0x838] sm:$0xff]  ;;  %v904_v6 = vld [vmem:[%s2738_s25 + $0x7c0] sm:$0xff] }
 0x22f   : > { %1445 = vmatpush.msra.mxu0 %v886_v8  ;;  %1465 = vmatpush.msra.mxu1 %v1142_v9  ;;  %v1160_v7 = vld [vmem:[%s2738_s25 + $0xfc0] sm:$0xff]  ;;  %v905_v8 = vld [vmem:[%s2738_s25 + $0x7c8] sm:$0xff] }
 0x230   : > { %1485 = vmatpush.msra.mxu2 %v887_v10  ;;  %1505 = vmatpush.msra.mxu3 %v1143_v11  ;;  %v1161_v9 = vld [vmem:[%s2738_s25 + $0xfc8] sm:$0xff]  ;;  %v888_v10 = vld [vmem:[%s2738_s25 + $0x740] sm:$0xff] }
 0x231   : > { %1446 = vmatpush.msra.mxu0 %v870_v12  ;;  %1466 = vmatpush.msra.mxu1 %v1126_v13  ;;  %v1144_v11 = vld [vmem:[%s2738_s25 + $0xf40] sm:$0xff]  ;;  %v889_v12 = vld [vmem:[%s2738_s25 + $0x748] sm:$0xff] }
 0x232   : > { %1486 = vmatpush.msra.mxu2 %v871_v14  ;;  %1506 = vmatpush.msra.mxu3 %v1127_v15  ;;  %v1145_v13 = vld [vmem:[%s2738_s25 + $0xf48] sm:$0xff]  ;;  %v872_v14 = vld [vmem:[%s2738_s25 + $0x6c0] sm:$0xff] }
 0x233   : > { %1447 = vmatpush.msra.mxu0 %v854_v16  ;;  %1467 = vmatpush.msra.mxu1 %v1110_v17  ;;  %v1128_v15 = vld [vmem:[%s2738_s25 + $0xec0] sm:$0xff]  ;;  %v873_v16 = vld [vmem:[%s2738_s25 + $0x6c8] sm:$0xff] }
 0x234   : > { %1487 = vmatpush.msra.mxu2 %v855_v18  ;;  %1507 = vmatpush.msra.mxu3 %v1111_v19  ;;  %v1129_v17 = vld [vmem:[%s2738_s25 + $0xec8] sm:$0xff]  ;;  %v856_v18 = vld [vmem:[%s2738_s25 + $0x640] sm:$0xff] }
 0x235   : > { %1448 = vmatpush.msra.mxu0 %v838_v20  ;;  %1468 = vmatpush.msra.mxu1 %v1094_v21  ;;  %v1112_v19 = vld [vmem:[%s2738_s25 + $0xe40] sm:$0xff]  ;;  %v857_v20 = vld [vmem:[%s2738_s25 + $0x648] sm:$0xff] }
 0x236   : > { %1488 = vmatpush.msra.mxu2 %v839_v22  ;;  %1508 = vmatpush.msra.mxu3 %v1095_v23  ;;  %v1113_v21 = vld [vmem:[%s2738_s25 + $0xe48] sm:$0xff]  ;;  %v840_v22 = vld [vmem:[%s2738_s25 + $0x5c0] sm:$0xff] }
 0x237   : > { %1449 = vmatpush.msra.mxu0 %v822_v24  ;;  %1469 = vmatpush.msra.mxu1 %v1078_v25  ;;  %v1096_v23 = vld [vmem:[%s2738_s25 + $0xdc0] sm:$0xff]  ;;  %v841_v24 = vld [vmem:[%s2738_s25 + $0x5c8] sm:$0xff] }
 0x238   : > { %1489 = vmatpush.msra.mxu2 %v823_v26  ;;  %1509 = vmatpush.msra.mxu3 %v1079_v27  ;;  %v1097_v25 = vld [vmem:[%s2738_s25 + $0xdc8] sm:$0xff]  ;;  %v824_v26 = vld [vmem:[%s2738_s25 + $0x540] sm:$0xff] }
 0x239   : > { %1450 = vmatpush.msra.mxu0 %v806_v28  ;;  %1470 = vmatpush.msra.mxu1 %v1062_v29  ;;  %v1080_v27 = vld [vmem:[%s2738_s25 + $0xd40] sm:$0xff]  ;;  %v825_v28 = vld [vmem:[%s2738_s25 + $0x548] sm:$0xff] }
 0x23a   : > { %1490 = vmatpush.msra.mxu2 %v807_v30  ;;  %1510 = vmatpush.msra.mxu3 %v1063_v31  ;;  %v1081_v29 = vld [vmem:[%s2738_s25 + $0xd48] sm:$0xff]  ;;  %v808_v30 = vld [vmem:[%s2738_s25 + $0x4c0] sm:$0xff] }
 0x23b   : > { %1451 = vmatpush.msra.mxu0 %v790_v32  ;;  %1471 = vmatpush.msra.mxu1 %v1046_v33  ;;  %v1064_v31 = vld [vmem:[%s2738_s25 + $0xcc0] sm:$0xff]  ;;  %v809_v32 = vld [vmem:[%s2738_s25 + $0x4c8] sm:$0xff] }
 0x23c   : > { %1491 = vmatpush.msra.mxu2 %v791_v34  ;;  %1511 = vmatpush.msra.mxu3 %v1047_v35  ;;  %v1065_v33 = vld [vmem:[%s2738_s25 + $0xcc8] sm:$0xff]  ;;  %v792_v34 = vld [vmem:[%s2738_s25 + $0x440] sm:$0xff] }
 0x23d   : > { %1452 = vmatpush.msra.mxu0 %v774_v36  ;;  %1472 = vmatpush.msra.mxu1 %v1030_v37  ;;  %v1048_v35 = vld [vmem:[%s2738_s25 + $0xc40] sm:$0xff]  ;;  %v793_v36 = vld [vmem:[%s2738_s25 + $0x448] sm:$0xff] }
 0x23e   : > { %1492 = vmatpush.msra.mxu2 %v775_v38  ;;  %1512 = vmatpush.msra.mxu3 %v1031_v39  ;;  %v1049_v37 = vld [vmem:[%s2738_s25 + $0xc48] sm:$0xff]  ;;  %v776_v38 = vld [vmem:[%s2738_s25 + $0x3c0] sm:$0xff] }
 0x23f   : > { %1453 = vmatpush.msra.mxu0 %v758_v40  ;;  %1473 = vmatpush.msra.mxu1 %v1014_v41  ;;  %v1032_v39 = vld [vmem:[%s2738_s25 + $0xbc0] sm:$0xff]  ;;  %v777_v40 = vld [vmem:[%s2738_s25 + $0x3c8] sm:$0xff] }
 0x240   : > { %1493 = vmatpush.msra.mxu2 %v759_v42  ;;  %1513 = vmatpush.msra.mxu3 %v1015_v43  ;;  %v1033_v41 = vld [vmem:[%s2738_s25 + $0xbc8] sm:$0xff]  ;;  %v760_v42 = vld [vmem:[%s2738_s25 + $0x340] sm:$0xff] }
 0x241   : > { %1454 = vmatpush.msra.mxu0 %v742_v44  ;;  %1474 = vmatpush.msra.mxu1 %v998_v45  ;;  %v1016_v43 = vld [vmem:[%s2738_s25 + $0xb40] sm:$0xff]  ;;  %v761_v44 = vld [vmem:[%s2738_s25 + $0x348] sm:$0xff] }
 0x242   : > { %1494 = vmatpush.msra.mxu2 %v743_v46  ;;  %1514 = vmatpush.msra.mxu3 %v999_v47  ;;  %v1017_v45 = vld [vmem:[%s2738_s25 + $0xb48] sm:$0xff]  ;;  %v744_v46 = vld [vmem:[%s2738_s25 + $0x2c0] sm:$0xff] }
 0x243   : > { %1455 = vmatpush.msra.mxu0 %v726_v48  ;;  %1475 = vmatpush.msra.mxu1 %v982_v49  ;;  %v1000_v47 = vld [vmem:[%s2738_s25 + $0xac0] sm:$0xff]  ;;  %v745_v48 = vld [vmem:[%s2738_s25 + $0x2c8] sm:$0xff] }
 0x244   : > { %1495 = vmatpush.msra.mxu2 %v727_v50  ;;  %1515 = vmatpush.msra.mxu3 %v983_v51  ;;  %v1001_v49 = vld [vmem:[%s2738_s25 + $0xac8] sm:$0xff]  ;;  %v728_v50 = vld [vmem:[%s2738_s25 + $0x240] sm:$0xff] }
 0x245   : > { %1456 = vmatpush.msra.mxu0 %v710_v52  ;;  %1476 = vmatpush.msra.mxu1 %v966_v53  ;;  %v984_v51 = vld [vmem:[%s2738_s25 + $0xa40] sm:$0xff]  ;;  %v729_v52 = vld [vmem:[%s2738_s25 + $0x248] sm:$0xff] }
 0x246   : > { %1496 = vmatpush.msra.mxu2 %v711_v54  ;;  %1516 = vmatpush.msra.mxu3 %v967_v55  ;;  %v985_v53 = vld [vmem:[%s2738_s25 + $0xa48] sm:$0xff]  ;;  %v712_v54 = vld [vmem:[%s2738_s25 + $0x1c0] sm:$0xff] }
 0x247   : > { %1457 = vmatpush.msra.mxu0 %v694_v56  ;;  %1477 = vmatpush.msra.mxu1 %v950_v57  ;;  %v968_v55 = vld [vmem:[%s2738_s25 + $0x9c0] sm:$0xff]  ;;  %v713_v56 = vld [vmem:[%s2738_s25 + $0x1c8] sm:$0xff] }
 0x248   : > { %1497 = vmatpush.msra.mxu2 %v695_v58  ;;  %1517 = vmatpush.msra.mxu3 %v951_v59  ;;  %v969_v57 = vld [vmem:[%s2738_s25 + $0x9c8] sm:$0xff]  ;;  %v696_v58 = vld [vmem:[%s2738_s25 + $0x140] sm:$0xff] }
 0x249   : > { %1458 = vmatpush.msra.mxu0 %v678_v60  ;;  %1478 = vmatpush.msra.mxu1 %v934_v61  ;;  %v952_v59 = vld [vmem:[%s2738_s25 + $0x940] sm:$0xff]  ;;  %v697_v60 = vld [vmem:[%s2738_s25 + $0x148] sm:$0xff] }
 0x24a   : > { %1498 = vmatpush.msra.mxu2 %v679_v62  ;;  %1518 = vmatpush.msra.mxu3 %v935_v63  ;;  %v953_v61 = vld [vmem:[%s2738_s25 + $0x948] sm:$0xff]  ;;  %v680_v62 = vld [vmem:[%s2738_s25 + $0xc0] sm:$0xff] }
 0x24b   : > { %1459 = vmatpush.msra.mxu0 %v662_v1  ;;  %1479 = vmatpush.msra.mxu1 %v918_v2  ;;  %v936_v63 = vld [vmem:[%s2738_s25 + $0x8c0] sm:$0xff]  ;;  %v681_v1 = vld [vmem:[%s2738_s25 + $0xc8] sm:$0xff] }
 0x24c   : > { %1499 = vmatpush.msra.mxu2 %v663_v4  ;;  %1519 = vmatpush.msra.mxu3 %v919_v5  ;;  %v937_v2 = vld [vmem:[%s2738_s25 + $0x8c8] sm:$0xff]  ;;  %v664_v4 = vld [vmem:[%s2738_s25 + $0x40] sm:$0xff] }
 0x24d   : > { %1460 = vmatmul.f32.vlgmr.msra.gmra.mxu0 %v2874_v0  ;;  %1480 = vmatmul.f32.vlgmr.msra.gmra.mxu1 %v2878_v3  ;;  %v920_v5 = vld [vmem:[%s2738_s25 + $0x840] sm:$0xff] }
 0x24e   : > { %1500 = vmatmul.f32.vlgmr.msra.gmra.mxu2 %v2874_v0  ;;  %1520 = vmatmul.f32.vlgmr.msra.gmra.mxu3 %v2878_v3 }
 0x24f   : > { %1524 = vmatpush.msrb.mxu0 %v904_v6  ;;  %1544 = vmatpush.msrb.mxu1 %v1160_v7  ;;  %v665_v6 = vld [vmem:[%s2738_s25 + $0x48] sm:$0xff] }
 0x250   : > { %1564 = vmatpush.msrb.mxu2 %v905_v8  ;;  %1584 = vmatpush.msrb.mxu3 %v1161_v9  ;;  %v921_v7 = vld [vmem:[%s2738_s25 + $0x848] sm:$0xff]  ;;  %v906_v8 = vld [vmem:[%s2738_s25 + $0x7d0] sm:$0xff] }
 0x251   : > { %1525 = vmatpush.msrb.mxu0 %v888_v10  ;;  %1545 = vmatpush.msrb.mxu1 %v1144_v11  ;;  %v1162_v9 = vld [vmem:[%s2738_s25 + $0xfd0] sm:$0xff]  ;;  %v907_v10 = vld [vmem:[%s2738_s25 + $0x7d8] sm:$0xff] }
 0x252   : > { %1565 = vmatpush.msrb.mxu2 %v889_v12  ;;  %1585 = vmatpush.msrb.mxu3 %v1145_v13  ;;  %v1163_v11 = vld [vmem:[%s2738_s25 + $0xfd8] sm:$0xff]  ;;  %v890_v12 = vld [vmem:[%s2738_s25 + $0x750] sm:$0xff] }
 0x253   : > { %1526 = vmatpush.msrb.mxu0 %v872_v14  ;;  %1546 = vmatpush.msrb.mxu1 %v1128_v15  ;;  %v1146_v13 = vld [vmem:[%s2738_s25 + $0xf50] sm:$0xff]  ;;  %v891_v14 = vld [vmem:[%s2738_s25 + $0x758] sm:$0xff] }
 0x254   : > { %1566 = vmatpush.msrb.mxu2 %v873_v16  ;;  %1586 = vmatpush.msrb.mxu3 %v1129_v17  ;;  %v1147_v15 = vld [vmem:[%s2738_s25 + $0xf58] sm:$0xff]  ;;  %v874_v16 = vld [vmem:[%s2738_s25 + $0x6d0] sm:$0xff] }
 0x255   : > { %1527 = vmatpush.msrb.mxu0 %v856_v18  ;;  %1547 = vmatpush.msrb.mxu1 %v1112_v19  ;;  %v1130_v17 = vld [vmem:[%s2738_s25 + $0xed0] sm:$0xff]  ;;  %v875_v18 = vld [vmem:[%s2738_s25 + $0x6d8] sm:$0xff] }
 0x256   : > { %1567 = vmatpush.msrb.mxu2 %v857_v20  ;;  %1587 = vmatpush.msrb.mxu3 %v1113_v21  ;;  %v1131_v19 = vld [vmem:[%s2738_s25 + $0xed8] sm:$0xff]  ;;  %v858_v20 = vld [vmem:[%s2738_s25 + $0x650] sm:$0xff] }
 0x257   : > { %1528 = vmatpush.msrb.mxu0 %v840_v22  ;;  %1548 = vmatpush.msrb.mxu1 %v1096_v23  ;;  %v1114_v21 = vld [vmem:[%s2738_s25 + $0xe50] sm:$0xff]  ;;  %v859_v22 = vld [vmem:[%s2738_s25 + $0x658] sm:$0xff] }
 0x258   : > { %1568 = vmatpush.msrb.mxu2 %v841_v24  ;;  %1588 = vmatpush.msrb.mxu3 %v1097_v25  ;;  %v1115_v23 = vld [vmem:[%s2738_s25 + $0xe58] sm:$0xff]  ;;  %v842_v24 = vld [vmem:[%s2738_s25 + $0x5d0] sm:$0xff] }
 0x259   : > { %1529 = vmatpush.msrb.mxu0 %v824_v26  ;;  %1549 = vmatpush.msrb.mxu1 %v1080_v27  ;;  %v1098_v25 = vld [vmem:[%s2738_s25 + $0xdd0] sm:$0xff]  ;;  %v843_v26 = vld [vmem:[%s2738_s25 + $0x5d8] sm:$0xff] }
 0x25a   : > { %1569 = vmatpush.msrb.mxu2 %v825_v28  ;;  %1589 = vmatpush.msrb.mxu3 %v1081_v29  ;;  %v1099_v27 = vld [vmem:[%s2738_s25 + $0xdd8] sm:$0xff]  ;;  %v826_v28 = vld [vmem:[%s2738_s25 + $0x550] sm:$0xff] }
 0x25b   : > { %1530 = vmatpush.msrb.mxu0 %v808_v30  ;;  %1550 = vmatpush.msrb.mxu1 %v1064_v31  ;;  %v1082_v29 = vld [vmem:[%s2738_s25 + $0xd50] sm:$0xff]  ;;  %v827_v30 = vld [vmem:[%s2738_s25 + $0x558] sm:$0xff] }
 0x25c   : > { %1570 = vmatpush.msrb.mxu2 %v809_v32  ;;  %1590 = vmatpush.msrb.mxu3 %v1065_v33  ;;  %v1083_v31 = vld [vmem:[%s2738_s25 + $0xd58] sm:$0xff]  ;;  %v810_v32 = vld [vmem:[%s2738_s25 + $0x4d0] sm:$0xff] }
 0x25d   : > { %1531 = vmatpush.msrb.mxu0 %v792_v34  ;;  %1551 = vmatpush.msrb.mxu1 %v1048_v35  ;;  %v1066_v33 = vld [vmem:[%s2738_s25 + $0xcd0] sm:$0xff]  ;;  %v811_v34 = vld [vmem:[%s2738_s25 + $0x4d8] sm:$0xff] }
 0x25e   : > { %1571 = vmatpush.msrb.mxu2 %v793_v36  ;;  %1591 = vmatpush.msrb.mxu3 %v1049_v37  ;;  %v1067_v35 = vld [vmem:[%s2738_s25 + $0xcd8] sm:$0xff]  ;;  %v794_v36 = vld [vmem:[%s2738_s25 + $0x450] sm:$0xff] }
 0x25f   : > { %1532 = vmatpush.msrb.mxu0 %v776_v38  ;;  %1552 = vmatpush.msrb.mxu1 %v1032_v39  ;;  %v1050_v37 = vld [vmem:[%s2738_s25 + $0xc50] sm:$0xff]  ;;  %v795_v38 = vld [vmem:[%s2738_s25 + $0x458] sm:$0xff] }
 0x260   : > { %1572 = vmatpush.msrb.mxu2 %v777_v40  ;;  %1592 = vmatpush.msrb.mxu3 %v1033_v41  ;;  %v1051_v39 = vld [vmem:[%s2738_s25 + $0xc58] sm:$0xff]  ;;  %v778_v40 = vld [vmem:[%s2738_s25 + $0x3d0] sm:$0xff] }
 0x261   : > { %1533 = vmatpush.msrb.mxu0 %v760_v42  ;;  %1553 = vmatpush.msrb.mxu1 %v1016_v43  ;;  %v1034_v41 = vld [vmem:[%s2738_s25 + $0xbd0] sm:$0xff]  ;;  %v779_v43 = vld [vmem:[%s2738_s25 + $0x3d8] sm:$0xff] }
 0x262   : > { %1573 = vmatpush.msrb.mxu2 %v761_v44  ;;  %1593 = vmatpush.msrb.mxu3 %v1017_v45  ;;  %v3138_v42 = vld [vmem:[%s453_s18] sm:$0xff]  ;;  %v1035_v44 = vld [vmem:[%s2738_s25 + $0xbd8] sm:$0xff] }
 0x263   : > { %1534 = vmatpush.msrb.mxu0 %v744_v46  ;;  %1554 = vmatpush.msrb.mxu1 %v1000_v47  ;;  %v762_v45 = vld [vmem:[%s2738_s25 + $0x350] sm:$0xff]  ;;  %v763_v47 = vld [vmem:[%s2738_s25 + $0x358] sm:$0xff] }
 0x264   : > { %1574 = vmatpush.msrb.mxu2 %v745_v48  ;;  %1594 = vmatpush.msrb.mxu3 %v1001_v49  ;;  %v1018_v46 = vld [vmem:[%s2738_s25 + $0xb50] sm:$0xff]  ;;  %v1019_v48 = vld [vmem:[%s2738_s25 + $0xb58] sm:$0xff]  ;;  %v1172_v49 = vperm.slane %v3138_v42, 0 }
 0x265   : > { %1535 = vmatpush.msrb.mxu0 %v728_v50  ;;  %1555 = vmatpush.msrb.mxu1 %v984_v51  ;;  %v746_v50 = vld [vmem:[%s2738_s25 + $0x2d0] sm:$0xff] }
 0x266   : > { %1575 = vmatpush.msrb.mxu2 %v729_v52  ;;  %1595 = vmatpush.msrb.mxu3 %v985_v53  ;;  %v1002_v51 = vld [vmem:[%s2738_s25 + $0xad0] sm:$0xff]  ;;  %v747_v52 = vld [vmem:[%s2738_s25 + $0x2d8] sm:$0xff] }
 0x267   : > { %1536 = vmatpush.msrb.mxu0 %v712_v54  ;;  %1556 = vmatpush.msrb.mxu1 %v968_v55  ;;  %v1003_v53 = vld [vmem:[%s2738_s25 + $0xad8] sm:$0xff]  ;;  %v730_v54 = vld [vmem:[%s2738_s25 + $0x250] sm:$0xff] }
 0x268   : > { %1576 = vmatpush.msrb.mxu2 %v713_v56  ;;  %1596 = vmatpush.msrb.mxu3 %v969_v57  ;;  %v986_v55 = vld [vmem:[%s2738_s25 + $0xa50] sm:$0xff]  ;;  %v731_v57 = vld [vmem:[%s2738_s25 + $0x258] sm:$0xff] }
 0x269   : > { %1537 = vmatpush.msrb.mxu0 %v696_v58  ;;  %1557 = vmatpush.msrb.mxu1 %v952_v59  ;;  %v987_v58 = vld [vmem:[%s2738_s25 + $0xa58] sm:$0xff] }
 0x26a   : > { %1577 = vmatpush.msrb.mxu2 %v697_v60  ;;  %1597 = vmatpush.msrb.mxu3 %v953_v61  ;;  %v714_v60 = vld [vmem:[%s2738_s25 + $0x1d0] sm:$0xff] }
 0x26b   : > { %1538 = vmatpush.msrb.mxu0 %v680_v62  ;;  %1558 = vmatpush.msrb.mxu1 %v936_v63  ;;  %v970_v61 = vld [vmem:[%s2738_s25 + $0x9d0] sm:$0xff]  ;;  %v715_v63 = vld [vmem:[%s2738_s25 + $0x1d8] sm:$0xff] }
 0x26c   : > { %1578 = vmatpush.msrb.mxu2 %v681_v1  ;;  %1598 = vmatpush.msrb.mxu3 %v937_v2  ;;  %v971_v1 = vld [vmem:[%s2738_s25 + $0x9d8] sm:$0xff] }
 0x26d   : > { %1539 = vmatpush.msrb.mxu0 %v664_v4  ;;  %1559 = vmatpush.msrb.mxu1 %v920_v5  ;;  %v1173_v4 = vperm.slane %v3138_v42, 1  ;;  %v698_v5 = vld [vmem:[%s2738_s25 + $0x150] sm:$0xff] }
 0x26e   : > { %1579 = vmatpush.msrb.mxu2 %v665_v6  ;;  %1599 = vmatpush.msrb.mxu3 %v921_v7  ;;  %v954_v6 = vld [vmem:[%s2738_s25 + $0x950] sm:$0xff]  ;;  %v699_v7 = vld [vmem:[%s2738_s25 + $0x158] sm:$0xff] }
 0x26f   : > { %1540 = vmatmul.f32.vlgmr.msrb.gmra.mxu0 %v2874_v0  ;;  %1560 = vmatmul.f32.vlgmr.msrb.gmra.mxu1 %v2878_v3 }
 0x270   : > { %1580 = vmatmul.f32.vlgmr.msrb.gmra.mxu2 %v2874_v0  ;;  %1600 = vmatmul.f32.vlgmr.msrb.gmra.mxu3 %v2878_v3 }
 0x271   : > { %1604 = vmatpush.msra.mxu0 %v906_v8  ;;  %1624 = vmatpush.msra.mxu1 %v1162_v9  ;;  %v955_v8 = vld [vmem:[%s2738_s25 + $0x958] sm:$0xff]  ;;  %v682_v9 = vld [vmem:[%s2738_s25 + $0xd0] sm:$0xff] }
 0x272   : > { %1644 = vmatpush.msra.mxu2 %v907_v10  ;;  %1664 = vmatpush.msra.mxu3 %v1163_v11  ;;  %v938_v10 = vld [vmem:[%s2738_s25 + $0x8d0] sm:$0xff] }
 0x273   : > { %1605 = vmatpush.msra.mxu0 %v890_v12  ;;  %1625 = vmatpush.msra.mxu1 %v1146_v13  ;;  %v683_v12 = vld [vmem:[%s2738_s25 + $0xd8] sm:$0xff] }
 0x274   : > { %1645 = vmatpush.msra.mxu2 %v891_v14  ;;  %1665 = vmatpush.msra.mxu3 %v1147_v15  ;;  %v939_v13 = vld [vmem:[%s2738_s25 + $0x8d8] sm:$0xff]  ;;  %v1174_v15 = vperm.slane %v3138_v42, 2 }
 0x275   : > { %1606 = vmatpush.msra.mxu0 %v874_v16  ;;  %1626 = vmatpush.msra.mxu1 %v1130_v17  ;;  %v666_v16 = vld [vmem:[%s2738_s25 + $0x50] sm:$0xff] }
 0x276   : > { %1646 = vmatpush.msra.mxu2 %v875_v18  ;;  %1666 = vmatpush.msra.mxu3 %v1131_v19  ;;  %v922_v17 = vld [vmem:[%s2738_s25 + $0x850] sm:$0xff]  ;;  %v667_v19 = vld [vmem:[%s2738_s25 + $0x58] sm:$0xff] }
 0x277   : > { %1607 = vmatpush.msra.mxu0 %v858_v20  ;;  %1627 = vmatpush.msra.mxu1 %v1114_v21  ;;  %v923_v20 = vld [vmem:[%s2738_s25 + $0x858] sm:$0xff] }
 0x278   : > { %1647 = vmatpush.msra.mxu2 %v859_v22  ;;  %1667 = vmatpush.msra.mxu3 %v1115_v23 }
 0x279   : > { %1608 = vmatpush.msra.mxu0 %v842_v24  ;;  %1628 = vmatpush.msra.mxu1 %v1098_v25  ;;  %v908_v24 = vld [vmem:[%s2738_s25 + $0x7e0] sm:$0xff] }
 0x27a   : > { %1648 = vmatpush.msra.mxu2 %v843_v26  ;;  %1668 = vmatpush.msra.mxu3 %v1099_v27  ;;  %v1164_v25 = vld [vmem:[%s2738_s25 + $0xfe0] sm:$0xff]  ;;  %v909_v27 = vld [vmem:[%s2738_s25 + $0x7e8] sm:$0xff] }
 0x27b   : > { %1609 = vmatpush.msra.mxu0 %v826_v28  ;;  %1629 = vmatpush.msra.mxu1 %v1082_v29  ;;  %v1165_v28 = vld [vmem:[%s2738_s25 + $0xfe8] sm:$0xff] }
 0x27c   : > { %1649 = vmatpush.msra.mxu2 %v827_v30  ;;  %1669 = vmatpush.msra.mxu3 %v1083_v31  ;;  %v892_v30 = vld [vmem:[%s2738_s25 + $0x760] sm:$0xff] }
 0x27d   : > { %1610 = vmatpush.msra.mxu0 %v810_v32  ;;  %1630 = vmatpush.msra.mxu1 %v1066_v33  ;;  %v1148_v31 = vld [vmem:[%s2738_s25 + $0xf60] sm:$0xff]  ;;  %v1175_v32 = vperm.slane %v3138_v42, 3  ;;  %v893_v33 = vld [vmem:[%s2738_s25 + $0x768] sm:$0xff] }
 0x27e   : > { %1650 = vmatpush.msra.mxu2 %v811_v34  ;;  %1670 = vmatpush.msra.mxu3 %v1067_v35  ;;  %v1149_v34 = vld [vmem:[%s2738_s25 + $0xf68] sm:$0xff]  ;;  %v876_v35 = vld [vmem:[%s2738_s25 + $0x6e0] sm:$0xff] }
 0x27f   : > { %1611 = vmatpush.msra.mxu0 %v794_v36  ;;  %1631 = vmatpush.msra.mxu1 %v1050_v37  ;;  %v1132_v36 = vld [vmem:[%s2738_s25 + $0xee0] sm:$0xff]  ;;  %v877_v37 = vld [vmem:[%s2738_s25 + $0x6e8] sm:$0xff] }
 0x280   : > { %1651 = vmatpush.msra.mxu2 %v795_v38  ;;  %1671 = vmatpush.msra.mxu3 %v1051_v39  ;;  %v1133_v38 = vld [vmem:[%s2738_s25 + $0xee8] sm:$0xff] }
 0x281   : > { %1612 = vmatpush.msra.mxu0 %v778_v40  ;;  %1632 = vmatpush.msra.mxu1 %v1034_v41  ;;  %v860_v40 = vld [vmem:[%s2738_s25 + $0x660] sm:$0xff] }
 0x282   : > { %1652 = vmatpush.msra.mxu2 %v779_v43  ;;  %1672 = vmatpush.msra.mxu3 %v1035_v44  ;;  %v1116_v41 = vld [vmem:[%s2738_s25 + $0xe60] sm:$0xff]  ;;  %v861_v44 = vld [vmem:[%s2738_s25 + $0x668] sm:$0xff] }
 0x283   : > { %1613 = vmatpush.msra.mxu0 %v762_v45  ;;  %1633 = vmatpush.msra.mxu1 %v1018_v46  ;;  %v1117_v45 = vld [vmem:[%s2738_s25 + $0xe68] sm:$0xff] }
 0x284   : > { %1653 = vmatpush.msra.mxu2 %v763_v47  ;;  %1673 = vmatpush.msra.mxu3 %v1019_v48  ;;  %v1221_v56 = vpop.f32.mrf.mxu0  ;;  %v844_v47 = vld [vmem:[%s2738_s25 + $0x5e0] sm:$0xff] }
 0x285   : > { %1614 = vmatpush.msra.mxu0 %v746_v50  ;;  %1634 = vmatpush.msra.mxu1 %v1002_v51  ;;  %v1222_v59 = vadd.f32 %v1221_v56, %v1172_v49  ;;  %v1241_v62 = vpop.f32.mrf.mxu1  ;;  %v1100_v48 = vld [vmem:[%s2738_s25 + $0xde0] sm:$0xff]  ;;  %v845_v50 = vld [vmem:[%s2738_s25 + $0x5e8] sm:$0xff] }
 0x286   : > { %1654 = vmatpush.msra.mxu2 %v747_v52  ;;  %1674 = vmatpush.msra.mxu3 %v1003_v53  ;;  %v1101_v51 = vld [vmem:[%s2738_s25 + $0xde8] sm:$0xff]  ;;  %v828_v52 = vld [vmem:[%s2738_s25 + $0x560] sm:$0xff] }
 0x287   : > { %1615 = vmatpush.msra.mxu0 %v730_v54  ;;  %1635 = vmatpush.msra.mxu1 %v986_v55  ;;  %v1242_v2 = vadd.f32 %v1241_v62, %v1222_v59  ;;  %v1084_v53 = vld [vmem:[%s2738_s25 + $0xd60] sm:$0xff]  ;;  %v829_v54 = vld [vmem:[%s2738_s25 + $0x568] sm:$0xff] }
 0x288   : > { %1655 = vmatpush.msra.mxu2 %v731_v57  ;;  %1675 = vmatpush.msra.mxu3 %v987_v58  ;;  %v1085_v55 = vld [vmem:[%s2738_s25 + $0xd68] sm:$0xff]  ;;  %v812_v56 = vld [vmem:[%s2738_s25 + $0x4e0] sm:$0xff] }
 0x289   : > { %1616 = vmatpush.msra.mxu0 %v714_v60  ;;  %1636 = vmatpush.msra.mxu1 %v970_v61  ;;  %1844 = vst [vmem:[%s3167_s30] sm:$0xff] %v1242_v2  ;;  %v1068_v57 = vld [vmem:[%s2738_s25 + $0xce0] sm:$0xff]  ;;  %v813_v58 = vld [vmem:[%s2738_s25 + $0x4e8] sm:$0xff] }
 0x28a   : > { %1656 = vmatpush.msra.mxu2 %v715_v63  ;;  %1676 = vmatpush.msra.mxu3 %v971_v1  ;;  %v1261_v11 = vpop.f32.mrf.mxu2  ;;  %v1069_v59 = vld [vmem:[%s2738_s25 + $0xce8] sm:$0xff]  ;;  %v796_v60 = vld [vmem:[%s2738_s25 + $0x460] sm:$0xff] }
 0x28b   : > { %1617 = vmatpush.msra.mxu0 %v698_v5  ;;  %1637 = vmatpush.msra.mxu1 %v954_v6  ;;  %v1262_v14 = vadd.f32 %v1261_v11, %v1173_v4  ;;  %v1281_v18 = vpop.f32.mrf.mxu3  ;;  %v1052_v61 = vld [vmem:[%s2738_s25 + $0xc60] sm:$0xff]  ;;  %v797_v62 = vld [vmem:[%s2738_s25 + $0x468] sm:$0xff] }
 0x28c   : > { %1657 = vmatpush.msra.mxu2 %v699_v7  ;;  %1677 = vmatpush.msra.mxu3 %v955_v8  ;;  %v1053_v63 = vld [vmem:[%s2738_s25 + $0xc68] sm:$0xff]  ;;  %v780_v1 = vld [vmem:[%s2738_s25 + $0x3e0] sm:$0xff] }
 0x28d   : > { %1618 = vmatpush.msra.mxu0 %v682_v9  ;;  %1638 = vmatpush.msra.mxu1 %v938_v10  ;;  %v1282_v21 = vadd.f32 %v1281_v18, %v1262_v14  ;;  %v1036_v2 = vld [vmem:[%s2738_s25 + $0xbe0] sm:$0xff]  ;;  %v781_v4 = vld [vmem:[%s2738_s25 + $0x3e8] sm:$0xff]  ;;  %v1176_v14 = vperm.slane %v3138_v42, 4 }
 0x28e   : > { %1658 = vmatpush.msra.mxu2 %v683_v12  ;;  %1678 = vmatpush.msra.mxu3 %v939_v13  ;;  %v1301_v22 = vpop.f32.mrf.mxu0  ;;  %v1321_v26 = vpop.f32.mrf.mxu1  ;;  %v1037_v5 = vld [vmem:[%s2738_s25 + $0xbe8] sm:$0xff]  ;;  %v764_v6 = vld [vmem:[%s2738_s25 + $0x360] sm:$0xff] }
 0x28f   : > { %1619 = vmatpush.msra.mxu0 %v666_v16  ;;  %1639 = vmatpush.msra.mxu1 %v922_v17  ;;  %1845 = vst [vmem:[%s3167_s30 + $0x8] sm:$0xff] %v1282_v21  ;;  %v1302_v23 = vadd.f32 %v1301_v22, %v1174_v15  ;;  %v1020_v7 = vld [vmem:[%s2738_s25 + $0xb60] sm:$0xff]  ;;  %v765_v8 = vld [vmem:[%s2738_s25 + $0x368] sm:$0xff] }
 0x290   : > { %1659 = vmatpush.msra.mxu2 %v667_v19  ;;  %1679 = vmatpush.msra.mxu3 %v923_v20  ;;  %v1021_v9 = vld [vmem:[%s2738_s25 + $0xb68] sm:$0xff]  ;;  %v748_v10 = vld [vmem:[%s2738_s25 + $0x2e0] sm:$0xff] }
 0x291   : > { %1620 = vmatmul.f32.vlgmr.msra.gmra.mxu0 %v2874_v0  ;;  %1640 = vmatmul.f32.vlgmr.msra.gmra.mxu1 %v2878_v3  ;;  %v1322_v29 = vadd.f32 %v1321_v26, %v1302_v23  ;;  %v1004_v11 = vld [vmem:[%s2738_s25 + $0xae0] sm:$0xff]  ;;  %v749_v12 = vld [vmem:[%s2738_s25 + $0x2e8] sm:$0xff] }
 0x292   : > { %1660 = vmatmul.f32.vlgmr.msra.gmra.mxu2 %v2874_v0  ;;  %1680 = vmatmul.f32.vlgmr.msra.gmra.mxu3 %v2878_v3  ;;  %v1005_v13 = vld [vmem:[%s2738_s25 + $0xae8] sm:$0xff]  ;;  %v732_v15 = vld [vmem:[%s2738_s25 + $0x260] sm:$0xff] }
 0x293   : > { %1684 = vmatpush.msrb.mxu0 %v908_v24  ;;  %1704 = vmatpush.msrb.mxu1 %v1164_v25  ;;  %1846 = vst [vmem:[%s3167_s30 + $0x10] sm:$0xff] %v1322_v29  ;;  %v988_v16 = vld [vmem:[%s2738_s25 + $0xa60] sm:$0xff]  ;;  %v733_v17 = vld [vmem:[%s2738_s25 + $0x268] sm:$0xff] }
 0x294   : > { %1724 = vmatpush.msrb.mxu2 %v909_v27  ;;  %1744 = vmatpush.msrb.mxu3 %v1165_v28  ;;  %v989_v18 = vld [vmem:[%s2738_s25 + $0xa68] sm:$0xff]  ;;  %v716_v19 = vld [vmem:[%s2738_s25 + $0x1e0] sm:$0xff] }
 0x295   : > { %1685 = vmatpush.msrb.mxu0 %v892_v30  ;;  %1705 = vmatpush.msrb.mxu1 %v1148_v31  ;;  %v1341_v39 = vpop.f32.mrf.mxu2  ;;  %v1361_v46 = vpop.f32.mrf.mxu3  ;;  %v972_v20 = vld [vmem:[%s2738_s25 + $0x9e0] sm:$0xff]  ;;  %v717_v22 = vld [vmem:[%s2738_s25 + $0x1e8] sm:$0xff] }
 0x296   : > { %1725 = vmatpush.msrb.mxu2 %v893_v33  ;;  %1745 = vmatpush.msrb.mxu3 %v1149_v34  ;;  %v1342_v43 = vadd.f32 %v1341_v39, %v1175_v32  ;;  %v973_v23 = vld [vmem:[%s2738_s25 + $0x9e8] sm:$0xff]  ;;  %v700_v25 = vld [vmem:[%s2738_s25 + $0x160] sm:$0xff]  ;;  %v1177_v33 = vperm.slane %v3138_v42, 5 }
 0x297   : > { %1686 = vmatpush.msrb.mxu0 %v876_v35  ;;  %1706 = vmatpush.msrb.mxu1 %v1132_v36  ;;  %v956_v26 = vld [vmem:[%s2738_s25 + $0x960] sm:$0xff]  ;;  %v701_v28 = vld [vmem:[%s2738_s25 + $0x168] sm:$0xff] }
 0x298   : > { %1726 = vmatpush.msrb.mxu2 %v877_v37  ;;  %1746 = vmatpush.msrb.mxu3 %v1133_v38  ;;  %v1362_v49 = vadd.f32 %v1361_v46, %v1342_v43  ;;  %v957_v29 = vld [vmem:[%s2738_s25 + $0x968] sm:$0xff]  ;;  %v684_v31 = vld [vmem:[%s2738_s25 + $0xe0] sm:$0xff] }
 0x299   : > { %1687 = vmatpush.msrb.mxu0 %v860_v40  ;;  %1707 = vmatpush.msrb.mxu1 %v1116_v41  ;;  %v940_v32 = vld [vmem:[%s2738_s25 + $0x8e0] sm:$0xff]  ;;  %v685_v34 = vld [vmem:[%s2738_s25 + $0xe8] sm:$0xff] }
 0x29a   : > { %1727 = vmatpush.msrb.mxu2 %v861_v44  ;;  %1747 = vmatpush.msrb.mxu3 %v1117_v45  ;;  %1847 = vst [vmem:[%s3167_s30 + $0x18] sm:$0xff] %v1362_v49  ;;  %v941_v35 = vld [vmem:[%s2738_s25 + $0x8e8] sm:$0xff]  ;;  %v668_v36 = vld [vmem:[%s2738_s25 + $0x60] sm:$0xff]  ;;  %v910_v44 = vld [vmem:[%s2738_s25 + $0x7f0] sm:$0xff] }
 0x29b   : > { %1688 = vmatpush.msrb.mxu0 %v844_v47  ;;  %1708 = vmatpush.msrb.mxu1 %v1100_v48  ;;  %v924_v37 = vld [vmem:[%s2738_s25 + $0x860] sm:$0xff]  ;;  %v669_v38 = vld [vmem:[%s2738_s25 + $0x68] sm:$0xff]  ;;  %v1166_v45 = vld [vmem:[%s2738_s25 + $0xff0] sm:$0xff] }
 0x29c   : > { %1728 = vmatpush.msrb.mxu2 %v845_v50  ;;  %1748 = vmatpush.msrb.mxu3 %v1101_v51  ;;  %v925_v39 = vld [vmem:[%s2738_s25 + $0x868] sm:$0xff]  ;;  %v911_v47 = vld [vmem:[%s2738_s25 + $0x7f8] sm:$0xff]  ;;  %v894_v49 = vld [vmem:[%s2738_s25 + $0x770] sm:$0xff] }
 0x29d   : > { %1689 = vmatpush.msrb.mxu0 %v828_v52  ;;  %1709 = vmatpush.msrb.mxu1 %v1084_v53  ;;  %v1167_v48 = vld [vmem:[%s2738_s25 + $0xff8] sm:$0xff]  ;;  %v1150_v50 = vld [vmem:[%s2738_s25 + $0xf70] sm:$0xff] }
 0x29e   : > { %1729 = vmatpush.msrb.mxu2 %v829_v54  ;;  %1749 = vmatpush.msrb.mxu3 %v1085_v55  ;;  %v895_v51 = vld [vmem:[%s2738_s25 + $0x778] sm:$0xff]  ;;  %v878_v53 = vld [vmem:[%s2738_s25 + $0x6f0] sm:$0xff] }
 0x29f   : > { %1690 = vmatpush.msrb.mxu0 %v812_v56  ;;  %1710 = vmatpush.msrb.mxu1 %v1068_v57  ;;  %v1151_v52 = vld [vmem:[%s2738_s25 + $0xf78] sm:$0xff]  ;;  %v1134_v54 = vld [vmem:[%s2738_s25 + $0xef0] sm:$0xff] }
 0x2a0   : > { %1730 = vmatpush.msrb.mxu2 %v813_v58  ;;  %1750 = vmatpush.msrb.mxu3 %v1069_v59  ;;  %v879_v55 = vld [vmem:[%s2738_s25 + $0x6f8] sm:$0xff]  ;;  %v862_v57 = vld [vmem:[%s2738_s25 + $0x670] sm:$0xff] }
 0x2a1   : > { %1691 = vmatpush.msrb.mxu0 %v796_v60  ;;  %1711 = vmatpush.msrb.mxu1 %v1052_v61  ;;  %v1135_v56 = vld [vmem:[%s2738_s25 + $0xef8] sm:$0xff]  ;;  %v1118_v58 = vld [vmem:[%s2738_s25 + $0xe70] sm:$0xff] }
 0x2a2   : > { %1731 = vmatpush.msrb.mxu2 %v797_v62  ;;  %1751 = vmatpush.msrb.mxu3 %v1053_v63  ;;  %v863_v59 = vld [vmem:[%s2738_s25 + $0x678] sm:$0xff]  ;;  %v846_v61 = vld [vmem:[%s2738_s25 + $0x5f0] sm:$0xff] }
 0x2a3   : > { %1692 = vmatpush.msrb.mxu0 %v780_v1  ;;  %1712 = vmatpush.msrb.mxu1 %v1036_v2  ;;  %v1119_v60 = vld [vmem:[%s2738_s25 + $0xe78] sm:$0xff]  ;;  %v1102_v62 = vld [vmem:[%s2738_s25 + $0xdf0] sm:$0xff] }
 0x2a4   : > { %1732 = vmatpush.msrb.mxu2 %v781_v4  ;;  %1752 = vmatpush.msrb.mxu3 %v1037_v5  ;;  %v847_v63 = vld [vmem:[%s2738_s25 + $0x5f8] sm:$0xff]  ;;  %v830_v2 = vld [vmem:[%s2738_s25 + $0x570] sm:$0xff] }
 0x2a5   : > { %1693 = vmatpush.msrb.mxu0 %v764_v6  ;;  %1713 = vmatpush.msrb.mxu1 %v1020_v7  ;;  %v1103_v1 = vld [vmem:[%s2738_s25 + $0xdf8] sm:$0xff]  ;;  %v1086_v4 = vld [vmem:[%s2738_s25 + $0xd70] sm:$0xff] }
 0x2a6   : > { %1733 = vmatpush.msrb.mxu2 %v765_v8  ;;  %1753 = vmatpush.msrb.mxu3 %v1021_v9  ;;  %v831_v5 = vld [vmem:[%s2738_s25 + $0x578] sm:$0xff]  ;;  %v814_v7 = vld [vmem:[%s2738_s25 + $0x4f0] sm:$0xff] }
 0x2a7   : > { %1694 = vmatpush.msrb.mxu0 %v748_v10  ;;  %1714 = vmatpush.msrb.mxu1 %v1004_v11  ;;  %v1087_v6 = vld [vmem:[%s2738_s25 + $0xd78] sm:$0xff]  ;;  %v1070_v8 = vld [vmem:[%s2738_s25 + $0xcf0] sm:$0xff] }
 0x2a8   : > { %1734 = vmatpush.msrb.mxu2 %v749_v12  ;;  %1754 = vmatpush.msrb.mxu3 %v1005_v13  ;;  %v1381_v21 = vpop.f32.mrf.mxu0  ;;  %v1401_v27 = vpop.f32.mrf.mxu1  ;;  %v815_v9 = vld [vmem:[%s2738_s25 + $0x4f8] sm:$0xff]  ;;  %v798_v11 = vld [vmem:[%s2738_s25 + $0x470] sm:$0xff] }
 0x2a9   : > { %1695 = vmatpush.msrb.mxu0 %v732_v15  ;;  %1715 = vmatpush.msrb.mxu1 %v988_v16  ;;  %v1382_v24 = vadd.f32 %v1381_v21, %v1176_v14  ;;  %v1071_v10 = vld [vmem:[%s2738_s25 + $0xcf8] sm:$0xff]  ;;  %v1054_v12 = vld [vmem:[%s2738_s25 + $0xc70] sm:$0xff] }
 0x2aa   : > { %1735 = vmatpush.msrb.mxu2 %v733_v17  ;;  %1755 = vmatpush.msrb.mxu3 %v989_v18  ;;  %v799_v13 = vld [vmem:[%s2738_s25 + $0x478] sm:$0xff]  ;;  %v782_v15 = vld [vmem:[%s2738_s25 + $0x3f0] sm:$0xff] }
 0x2ab   : > { %1696 = vmatpush.msrb.mxu0 %v716_v19  ;;  %1716 = vmatpush.msrb.mxu1 %v972_v20  ;;  %v1402_v30 = vadd.f32 %v1401_v27, %v1382_v24  ;;  %v1055_v14 = vld [vmem:[%s2738_s25 + $0xc78] sm:$0xff]  ;;  %v1038_v16 = vld [vmem:[%s2738_s25 + $0xbf0] sm:$0xff]  ;;  %v1178_v27 = vperm.slane %v3138_v42, 6 }
 0x2ac   : > { %1736 = vmatpush.msrb.mxu2 %v717_v22  ;;  %1756 = vmatpush.msrb.mxu3 %v973_v23  ;;  %v783_v17 = vld [vmem:[%s2738_s25 + $0x3f8] sm:$0xff]  ;;  %v766_v19 = vld [vmem:[%s2738_s25 + $0x370] sm:$0xff] }
 0x2ad   : > { %1697 = vmatpush.msrb.mxu0 %v700_v25  ;;  %1717 = vmatpush.msrb.mxu1 %v956_v26  ;;  %1848 = vst [vmem:[%s3167_s30 + $0x20] sm:$0xff] %v1402_v30  ;;  %v1039_v18 = vld [vmem:[%s2738_s25 + $0xbf8] sm:$0xff]  ;;  %v1022_v20 = vld [vmem:[%s2738_s25 + $0xb70] sm:$0xff] }
 0x2ae   : > { %1737 = vmatpush.msrb.mxu2 %v701_v28  ;;  %1757 = vmatpush.msrb.mxu3 %v957_v29  ;;  %v767_v21 = vld [vmem:[%s2738_s25 + $0x378] sm:$0xff]  ;;  %v750_v23 = vld [vmem:[%s2738_s25 + $0x2f0] sm:$0xff] }
 0x2af   : > { %1698 = vmatpush.msrb.mxu0 %v684_v31  ;;  %1718 = vmatpush.msrb.mxu1 %v940_v32  ;;  %v1421_v40 = vpop.f32.mrf.mxu2  ;;  %v1441_v43 = vpop.f32.mrf.mxu3  ;;  %v1023_v22 = vld [vmem:[%s2738_s25 + $0xb78] sm:$0xff]  ;;  %v1006_v24 = vld [vmem:[%s2738_s25 + $0xaf0] sm:$0xff] }
 0x2b0   : > { %1738 = vmatpush.msrb.mxu2 %v685_v34  ;;  %1758 = vmatpush.msrb.mxu3 %v941_v35  ;;  %v1422_v41 = vadd.f32 %v1421_v40, %v1177_v33  ;;  %v751_v25 = vld [vmem:[%s2738_s25 + $0x2f8] sm:$0xff]  ;;  %v734_v28 = vld [vmem:[%s2738_s25 + $0x270] sm:$0xff] }
 0x2b1   : > { %1699 = vmatpush.msrb.mxu0 %v668_v36  ;;  %1719 = vmatpush.msrb.mxu1 %v924_v37  ;;  %v1007_v26 = vld [vmem:[%s2738_s25 + $0xaf8] sm:$0xff]  ;;  %v990_v29 = vld [vmem:[%s2738_s25 + $0xa70] sm:$0xff] }
 0x2b2   : > { %1739 = vmatpush.msrb.mxu2 %v669_v38  ;;  %1759 = vmatpush.msrb.mxu3 %v925_v39  ;;  %v1442_v46 = vadd.f32 %v1441_v43, %v1422_v41  ;;  %v735_v30 = vld [vmem:[%s2738_s25 + $0x278] sm:$0xff]  ;;  %v718_v32 = vld [vmem:[%s2738_s25 + $0x1f0] sm:$0xff] }
 0x2b3   : > { %1700 = vmatmul.f32.vlgmr.msrb.gmra.mxu0 %v2874_v0  ;;  %1720 = vmatmul.f32.vlgmr.msrb.gmra.mxu1 %v2878_v3  ;;  %v991_v31 = vld [vmem:[%s2738_s25 + $0xa78] sm:$0xff]  ;;  %v974_v33 = vld [vmem:[%s2738_s25 + $0x9f0] sm:$0xff] }
 0x2b4   : > { %1740 = vmatmul.f32.vlgmr.msrb.gmra.mxu2 %v2874_v0  ;;  %1760 = vmatmul.f32.vlgmr.msrb.gmra.mxu3 %v2878_v3  ;;  %1849 = vst [vmem:[%s3167_s30 + $0x28] sm:$0xff] %v1442_v46  ;;  %v719_v35 = vld [vmem:[%s2738_s25 + $0x1f8] sm:$0xff]  ;;  %v702_v38 = vld [vmem:[%s2738_s25 + $0x170] sm:$0xff] }
 0x2b5   : > { %1764 = vmatpush.msra.mxu0 %v910_v44  ;;  %1784 = vmatpush.msra.mxu1 %v1166_v45  ;;  %v975_v36 = vld [vmem:[%s2738_s25 + $0x9f8] sm:$0xff]  ;;  %v958_v39 = vld [vmem:[%s2738_s25 + $0x970] sm:$0xff] }
 0x2b6   : > { %1804 = vmatpush.msra.mxu2 %v911_v47  ;;  %1824 = vmatpush.msra.mxu3 %v1167_v48  ;;  %v703_v41 = vld [vmem:[%s2738_s25 + $0x178] sm:$0xff]  ;;  %v686_v45 = vld [vmem:[%s2738_s25 + $0xf0] sm:$0xff]  ;;  %v1179_v47 = vperm.slane %v3138_v42, 7 }
 0x2b7   : > { %1765 = vmatpush.msra.mxu0 %v894_v49  ;;  %1785 = vmatpush.msra.mxu1 %v1150_v50  ;;  %v959_v43 = vld [vmem:[%s2738_s25 + $0x978] sm:$0xff]  ;;  %v942_v46 = vld [vmem:[%s2738_s25 + $0x8f0] sm:$0xff] }
 0x2b8   : > { %1805 = vmatpush.msra.mxu2 %v895_v51  ;;  %1825 = vmatpush.msra.mxu3 %v1151_v52  ;;  %v687_v48 = vld [vmem:[%s2738_s25 + $0xf8] sm:$0xff]  ;;  %v670_v50 = vld [vmem:[%s2738_s25 + $0x70] sm:$0xff] }
 0x2b9   : > { %1766 = vmatpush.msra.mxu0 %v878_v53  ;;  %1786 = vmatpush.msra.mxu1 %v1134_v54  ;;  %v943_v49 = vld [vmem:[%s2738_s25 + $0x8f8] sm:$0xff]  ;;  %v926_v51 = vld [vmem:[%s2738_s25 + $0x870] sm:$0xff] }
 0x2ba   : > { %1806 = vmatpush.msra.mxu2 %v879_v55  ;;  %1826 = vmatpush.msra.mxu3 %v1135_v56  ;;  %v671_v52 = vld [vmem:[%s2738_s25 + $0x78] sm:$0xff] }
 0x2bb   : > { %1767 = vmatpush.msra.mxu0 %v862_v57  ;;  %1787 = vmatpush.msra.mxu1 %v1118_v58  ;;  %v927_v53 = vld [vmem:[%s2738_s25 + $0x878] sm:$0xff] }
 0x2bc   : > { %1807 = vmatpush.msra.mxu2 %v863_v59  ;;  %1827 = vmatpush.msra.mxu3 %v1119_v60  ;;  %v1169_v57 = vld [vmem:[%s453_s18 + $0x8] sm:$0xff] }
 0x2bd   : > { %1768 = vmatpush.msra.mxu0 %v846_v61  ;;  %1788 = vmatpush.msra.mxu1 %v1102_v62  ;;  %v1180_v58 = vperm.slane %v1169_v57, 0 }
 0x2be   : > { %1808 = vmatpush.msra.mxu2 %v847_v63  ;;  %1828 = vmatpush.msra.mxu3 %v1103_v1  ;;  %v1181_v63 = vperm.slane %v1169_v57, 1 }
 0x2bf   : > { %1769 = vmatpush.msra.mxu0 %v830_v2  ;;  %1789 = vmatpush.msra.mxu1 %v1086_v4 }
 0x2c0   : > { %1809 = vmatpush.msra.mxu2 %v831_v5  ;;  %1829 = vmatpush.msra.mxu3 %v1087_v6 }
 0x2c1   : > { %1770 = vmatpush.msra.mxu0 %v814_v7  ;;  %1790 = vmatpush.msra.mxu1 %v1070_v8 }
 0x2c2   : > { %1810 = vmatpush.msra.mxu2 %v815_v9  ;;  %1830 = vmatpush.msra.mxu3 %v1071_v10  ;;  %v1183_v9 = vperm.slane %v1169_v57, 3 }
 0x2c3   : > { %1771 = vmatpush.msra.mxu0 %v798_v11  ;;  %1791 = vmatpush.msra.mxu1 %v1054_v12 }
 0x2c4   : > { %1811 = vmatpush.msra.mxu2 %v799_v13  ;;  %1831 = vmatpush.msra.mxu3 %v1055_v14  ;;  %v1184_v14 = vperm.slane %v1169_v57, 4 }
 0x2c5   : > { %1772 = vmatpush.msra.mxu0 %v782_v15  ;;  %1792 = vmatpush.msra.mxu1 %v1038_v16 }
 0x2c6   : > { %1812 = vmatpush.msra.mxu2 %v783_v17  ;;  %1832 = vmatpush.msra.mxu3 %v1039_v18 }
 0x2c7   : > { %1773 = vmatpush.msra.mxu0 %v766_v19  ;;  %1793 = vmatpush.msra.mxu1 %v1022_v20  ;;  %v1185_v19 = vperm.slane %v1169_v57, 5 }
 0x2c8   : > { %1813 = vmatpush.msra.mxu2 %v767_v21  ;;  %1833 = vmatpush.msra.mxu3 %v1023_v22 }
 0x2c9   : > { %1774 = vmatpush.msra.mxu0 %v750_v23  ;;  %1794 = vmatpush.msra.mxu1 %v1006_v24  ;;  %v1186_v24 = vperm.slane %v1169_v57, 6 }
 0x2ca   : > { %1814 = vmatpush.msra.mxu2 %v751_v25  ;;  %1834 = vmatpush.msra.mxu3 %v1007_v26  ;;  %v1461_v34 = vpop.f32.mrf.mxu0  ;;  %v1481_v40 = vpop.f32.mrf.mxu1 }
 0x2cb   : > { %1775 = vmatpush.msra.mxu0 %v734_v28  ;;  %1795 = vmatpush.msra.mxu1 %v990_v29  ;;  %v1462_v37 = vadd.f32 %v1461_v34, %v1178_v27  ;;  %v1187_v29 = vperm.slane %v1169_v57, 7 }
 0x2cc   : > { %1815 = vmatpush.msra.mxu2 %v735_v30  ;;  %1835 = vmatpush.msra.mxu3 %v991_v31 }
 0x2cd   : > { %1776 = vmatpush.msra.mxu0 %v718_v32  ;;  %1796 = vmatpush.msra.mxu1 %v974_v33  ;;  %v1482_v44 = vadd.f32 %v1481_v40, %v1462_v37 }
 0x2ce   : > { %1816 = vmatpush.msra.mxu2 %v719_v35  ;;  %1836 = vmatpush.msra.mxu3 %v975_v36 }
 0x2cf   : > { %1777 = vmatpush.msra.mxu0 %v702_v38  ;;  %1797 = vmatpush.msra.mxu1 %v958_v39  ;;  %1850 = vst [vmem:[%s3167_s30 + $0x30] sm:$0xff] %v1482_v44 }
 0x2d0   : > { %1817 = vmatpush.msra.mxu2 %v703_v41  ;;  %1837 = vmatpush.msra.mxu3 %v959_v43 }
 0x2d1   : > { %1778 = vmatpush.msra.mxu0 %v686_v45  ;;  %1798 = vmatpush.msra.mxu1 %v942_v46  ;;  %v1501_v54 = vpop.f32.mrf.mxu2  ;;  %v1521_v42 = vpop.f32.mrf.mxu3 }
 0x2d2   : > { %1818 = vmatpush.msra.mxu2 %v687_v48  ;;  %1838 = vmatpush.msra.mxu3 %v943_v49  ;;  %v1502_v55 = vadd.f32 %v1501_v54, %v1179_v47 }
 0x2d3   : > { %1779 = vmatpush.msra.mxu0 %v670_v50  ;;  %1799 = vmatpush.msra.mxu1 %v926_v51 }
 0x2d4   : > { %1819 = vmatpush.msra.mxu2 %v671_v52  ;;  %1839 = vmatpush.msra.mxu3 %v927_v53  ;;  %v1522_v56 = vadd.f32 %v1521_v42, %v1502_v55 }
 0x2d5   : > { %1780 = vmatmul.f32.vlgmr.msra.gmra.mxu0 %v2874_v0  ;;  %1800 = vmatmul.f32.vlgmr.msra.gmra.mxu1 %v2878_v3 }
 0x2d6   : > { %1820 = vmatmul.f32.vlgmr.msra.gmra.mxu2 %v2874_v0  ;;  %1840 = vmatmul.f32.vlgmr.msra.gmra.mxu3 %v2878_v3  ;;  %1851 = vst [vmem:[%s3167_s30 + $0x38] sm:$0xff] %v1522_v56  ;;  %v1182_v0 = vperm.slane %v1169_v57, 2 }
 0x2ec   : > { %v1541_v59 = vpop.f32.mrf.mxu0  ;;  %v1561_v61 = vpop.f32.mrf.mxu1 }
 0x2ed   : > { %v1542_v60 = vadd.f32 %v1541_v59, %v1180_v58 }
 0x2ef   : > { %v1562_v62 = vadd.f32 %v1561_v61, %v1542_v60 }
 0x2f1   : > { %1852 = vst [vmem:[%s3167_s30 + $0x40] sm:$0xff] %v1562_v62 }
 0x2f3   : > { %v1581_v1 = vpop.f32.mrf.mxu2  ;;  %v1601_v4 = vpop.f32.mrf.mxu3 }
 0x2f4   : > { %v1582_v2 = vadd.f32 %v1581_v1, %v1181_v63 }
 0x2f6   : > { %v1602_v5 = vadd.f32 %v1601_v4, %v1582_v2 }
 0x2f8   : > { %1853 = vst [vmem:[%s3167_s30 + $0x48] sm:$0xff] %v1602_v5 }
 0x30e   : > { %v1621_v6 = vpop.f32.mrf.mxu0  ;;  %v1641_v7 = vpop.f32.mrf.mxu1 }
 0x30f   : > { %v1622_v3 = vadd.f32 %v1621_v6, %v1182_v0 }
 0x311   : > { %v1642_v8 = vadd.f32 %v1641_v7, %v1622_v3 }
 0x313   : > { %1854 = vst [vmem:[%s3167_s30 + $0x50] sm:$0xff] %v1642_v8 }
 0x315   : > { %v1661_v10 = vpop.f32.mrf.mxu2  ;;  %v1681_v12 = vpop.f32.mrf.mxu3 }
 0x316   : > { %v1662_v11 = vadd.f32 %v1661_v10, %v1183_v9 }
 0x318   : > { %v1682_v13 = vadd.f32 %v1681_v12, %v1662_v11 }
 0x31a   : > { %1855 = vst [vmem:[%s3167_s30 + $0x58] sm:$0xff] %v1682_v13 }
 0x330   : > { %v1701_v15 = vpop.f32.mrf.mxu0  ;;  %v1721_v17 = vpop.f32.mrf.mxu1 }
 0x331   : > { %v1702_v16 = vadd.f32 %v1701_v15, %v1184_v14 }
 0x333   : > { %v1722_v18 = vadd.f32 %v1721_v17, %v1702_v16 }
 0x335   : > { %1856 = vst [vmem:[%s3167_s30 + $0x60] sm:$0xff] %v1722_v18 }
 0x337   : > { %v1741_v20 = vpop.f32.mrf.mxu2  ;;  %v1761_v22 = vpop.f32.mrf.mxu3 }
 0x338   : > { %v1742_v21 = vadd.f32 %v1741_v20, %v1185_v19 }
 0x33a   : > { %v1762_v23 = vadd.f32 %v1761_v22, %v1742_v21 }
 0x33c   : > { %1857 = vst [vmem:[%s3167_s30 + $0x68] sm:$0xff] %v1762_v23 }
 0x352   : > { %v1781_v25 = vpop.f32.mrf.mxu0  ;;  %v1801_v27 = vpop.f32.mrf.mxu1 }
 0x353   : > { %v1782_v26 = vadd.f32 %v1781_v25, %v1186_v24 }
 0x355   : > { %v1802_v28 = vadd.f32 %v1801_v27, %v1782_v26 }
 0x357   : > { %1858 = vst [vmem:[%s3167_s30 + $0x70] sm:$0xff] %v1802_v28 }
 0x359   : > { %v1821_v30 = vpop.f32.mrf.mxu2  ;;  %v1841_v32 = vpop.f32.mrf.mxu3 }
 0x35a   : > { %v1822_v31 = vadd.f32 %v1821_v30, %v1187_v29 }
 0x35c   : > { %v1842_v33 = vadd.f32 %v1841_v32, %v1822_v31 }
 0x35e   : > { %1859 = vst [vmem:[%s3167_s30 + $0x78] sm:$0xff] %v1842_v33 }
 0x35f PF: > { %s3390_s0 = sld [smem:[#allocation21_spill]]  ;;  %p23_p3 = scmp.ge.s32.totalorder %s2623_s15, 21  }
 0x360   : > { %s3391_s30 = smov %s2492_s10  ;;  %s3392_s10 = smov %s2496_s11 }
 0x361   : > { %s3394_s12 = smov %s2623_s15  ;;  %25 = sbr.rel (!%p23_p3) target bundleno = 12 (0xc), region = 136 }
 0x365   : > { %s3393_s11 = smov %s3390_s0 }
 0x366   :  { %1882 = vsyncpa [#allocation3], 1 }
 0x367   :  { %1884 = vsyncpa [#allocation3 + $0x1], 1 }
 0x368   :  { %1885 = vsyncpa [#allocation5], 1 }
 0x369   :  { %1886 = vsyncpa [#allocation8], 1 }
 0x36a   :  { %1887 = vsyncpa [#allocation11], 1 }
 0x36b   :  { %1888 = vsyncpa [#allocation14], 1 }
 0x36c   :  { %1890 = vsyncpa [#allocation14 + $0x1], 1 }

</bundles_post_ra>
